<compile_context>
chip_gen: v7x
topology: tpu7x:2x2x1
jax: 0.10.0
libtpu: 0.0.40
codegen_flags: <defaults>
</compile_context>

<pallas_src>
import functools
import math

import jax
import jax.numpy as jnp
import numpy as np
from jax.experimental import pallas as pl
from jax.experimental.pallas import tpu as pltpu


def _round_up(x, m):
    return (x + m - 1) // m * m


def _mca_kernel(text_ref, media_ref, cum_ref, nums_ref,
                gamma_ref, beta_ref,
                wq_ref, bq_ref, wk_ref, bk_ref, wv_ref, bv_ref,
                wo_ref, bo_ref,
                out_ref,
                k_scr, v_scr,
                *, heads, d_true, only_preceding):
    """Grid = (batch, query-tile). Fuses LayerNorm + QKV proj + masked MHA + out proj.

    K/V for the whole media sequence are computed only on the first query tile of
    each batch element and kept in VMEM scratch for the remaining tiles.
    """
    tq, d_pad = text_ref.shape          # query tile rows, padded feature dim
    s = media_ref.shape[0]              # flattened media length t*m

    # ---- K/V projections: once per batch element (first query tile only) ----
    @pl.when(pl.program_id(1) == 0)
    def _():
        med = media_ref[...].astype(jnp.bfloat16)                       # (s, d_pad)
        medb = jnp.broadcast_to(med[None], (heads, s, d_pad))           # (h, s, d_pad)
        k = jnp.einsum('hsd,hdf->hsf', medb, wk_ref[...],
                       preferred_element_type=jnp.float32) + bk_ref[...]
        v = jnp.einsum('hsd,hdf->hsf', medb, wv_ref[...],
                       preferred_element_type=jnp.float32) + bv_ref[...]
        k_scr[...] = k.astype(jnp.bfloat16)
        v_scr[...] = v.astype(jnp.bfloat16)

    # ---- LayerNorm(text tile) in f32; E[x^2]-mean^2 form tolerates the zero-padded
    #      feature columns (gamma/beta are zero-padded so padded cols stay 0) ----
    x = text_ref[...].astype(jnp.float32)
    inv_d = 1.0 / d_true
    mean = jnp.sum(x, axis=-1, keepdims=True) * inv_d
    meansq = jnp.sum(x * x, axis=-1, keepdims=True) * inv_d
    var = meansq - mean * mean
    xn = (x - mean) * jax.lax.rsqrt(var + 1e-5)
    xn = (xn * gamma_ref[...] + beta_ref[...]).astype(jnp.bfloat16)     # (tq, d_pad)

    # ---- Q projection (1/sqrt(dh) already folded into Wq/bq in the wrapper) ----
    xnb = jnp.broadcast_to(xn[None], (heads, tq, d_pad))                # (h, tq, d_pad)
    q = jnp.einsum('hnd,hdf->hnf', xnb, wq_ref[...],
                   preferred_element_type=jnp.float32) + bq_ref[...]    # (h, tq, dh)
    q = q.astype(jnp.bfloat16)

    # ---- additive mask bias: one (tq, s) select shared by all heads ----
    cum = cum_ref[...]                      # (tq, 1) int32 cumsum of media_locations
    nums = nums_ref[...]                    # (1, s)  int32 media frame index, 1..t
    allowed = (cum == nums) if only_preceding else (cum >= nums)        # (tq, s)
    bias = jnp.where(allowed, 0.0, -1e30).astype(jnp.float32)
    # Rows with no allowed key get zeroed output (FLAMINGO semantics) instead of NaN.
    has_any = (jnp.max(bias, axis=-1, keepdims=True) == 0.0).astype(jnp.float32)

    # ---- batched-head masked softmax attention (bf16 MXU, f32 accumulation) ----
    kb = k_scr[...]                                                     # (h, s, dh) bf16
    vb = v_scr[...]
    scores = jnp.einsum('hqf,hkf->hqk', q, kb,
                        preferred_element_type=jnp.float32)             # (h, tq, s)
    scores = scores + bias[None]
    mrow = jnp.max(scores, axis=-1, keepdims=True)
    p = jnp.exp(scores - mrow)
    denom = jnp.sum(p, axis=-1, keepdims=True)                          # (h, tq, 1)
    o = jnp.einsum('hqk,hkf->hqf', p.astype(jnp.bfloat16), vb,
                   preferred_element_type=jnp.float32)                  # (h, tq, dh)
    o = o * pl.reciprocal(denom, approx=True)                           # softmax normalize (EUP)

    # ---- output projection: y = sum_h O_h @ Wo_h + bo ----
    y3 = jnp.einsum('hqf,hfd->hqd', o.astype(jnp.bfloat16), wo_ref[...],
                    preferred_element_type=jnp.float32)                 # (h, tq, d_pad)
    y = jnp.sum(y3, axis=0) + bo_ref[...]                               # (tq, d_pad)
    y = y * has_any
    out_ref[...] = y.astype(out_ref.dtype)


def masked_cross_attention(text_tokens, media, media_locations, params,
                           *, heads=8, only_attend_immediate_media=True):
    b, n, d = text_tokens.shape
    _, t, m, _ = media.shape
    assert d % heads == 0
    dh = d // heads
    s = t * m

    # Lane-dense feature dim; query-dim tiling.
    d_pad = _round_up(d, 128)
    tq = min(256, _round_up(n, 8))
    n_pad = _round_up(n, tq)

    gamma, beta, wq, bq, wk, bk, wv, bv, wo, bo = params

    # Fold the attention scale into the Q projection (free constant folding).
    scale = 1.0 / math.sqrt(dh)
    wq = wq * scale
    bq = bq * scale

    # Head-major, d-padded, bf16 weights prepared once in the wrapper.
    def head_split_in(w):      # (d, d) -> (heads, d_pad, dh); pad the contraction axis
        w3 = w.reshape(d, heads, dh).transpose(1, 0, 2)
        return jnp.pad(w3, ((0, 0), (0, d_pad - d), (0, 0))).astype(jnp.bfloat16)

    def head_split_bias(bvec):  # (1, d) -> (heads, 1, dh); kept f32 (added post-accum)
        return bvec.reshape(heads, dh)[:, None, :].astype(jnp.float32)

    wq3, wk3, wv3 = head_split_in(wq), head_split_in(wk), head_split_in(wv)
    bq3, bk3, bv3 = head_split_bias(bq), head_split_bias(bk), head_split_bias(bv)
    wo3 = jnp.pad(wo.reshape(heads, dh, d),
                  ((0, 0), (0, 0), (0, d_pad - d))).astype(jnp.bfloat16)
    bo_p = jnp.pad(bo, ((0, 0), (0, d_pad - d))).astype(jnp.float32)
    gamma_p = jnp.pad(gamma, ((0, 0), (0, d_pad - d))).astype(jnp.float32)
    beta_p = jnp.pad(beta, ((0, 0), (0, d_pad - d))).astype(jnp.float32)

    # Lane/sublane-dense activations and mask scalars.
    text_p = jnp.pad(text_tokens, ((0, 0), (0, n_pad - n), (0, d_pad - d)))
    media_p = jnp.pad(media.reshape(b, s, d), ((0, 0), (0, 0), (0, d_pad - d)))
    cum = jnp.cumsum(media_locations.astype(jnp.int32), axis=-1)              # (b, n)
    cum = jnp.pad(cum, ((0, 0), (0, n_pad - n)))[:, :, None]                  # (b, n_pad, 1)
    nums = jnp.repeat(jnp.arange(1, t + 1, dtype=jnp.int32), m)[None, :]      # (1, s)

    kernel = functools.partial(_mca_kernel, heads=heads, d_true=d,
                               only_preceding=only_attend_immediate_media)

    def full(shape):
        return pl.BlockSpec(shape, lambda i, j, _s=shape: (0,) * len(_s))

    grid = (b, n_pad // tq)

    # Advisory cost estimate (helps XLA overlap the custom call with neighbours).
    flops = 2 * b * ((n_pad + 2 * s) * d_pad * d        # QKV projections
                     + 2 * heads * n_pad * s * dh       # scores + p@v
                     + n_pad * d * d_pad)               # output projection
    bytes_accessed = ((text_p.size + media_p.size + b * n_pad * d_pad) * 4
                      + (wq3.size + wk3.size + wv3.size + wo3.size) * 2)
    cost = pl.CostEstimate(flops=int(flops),
                           transcendentals=int(b * heads * n_pad * s),
                           bytes_accessed=int(bytes_accessed))

    out = pl.pallas_call(
        kernel,
        out_shape=jax.ShapeDtypeStruct((b, n_pad, d_pad), text_tokens.dtype),
        grid=grid,
        in_specs=[
            pl.BlockSpec((None, tq, d_pad), lambda i, j: (i, j, 0)),   # text tile
            pl.BlockSpec((None, s, d_pad), lambda i, j: (i, 0, 0)),    # media (reused over j)
            pl.BlockSpec((None, tq, 1), lambda i, j: (i, j, 0)),       # cumsum tile
            full((1, s)),                                              # media frame ids
            full((1, d_pad)), full((1, d_pad)),                        # LN gamma, beta
            full((heads, d_pad, dh)), full((heads, 1, dh)),            # Wq (scaled), bq
            full((heads, d_pad, dh)), full((heads, 1, dh)),            # Wk, bk
            full((heads, d_pad, dh)), full((heads, 1, dh)),            # Wv, bv
            full((heads, dh, d_pad)), full((1, d_pad)),                # Wo, bo
        ],
        out_specs=pl.BlockSpec((None, tq, d_pad), lambda i, j: (i, j, 0)),
        scratch_shapes=[pltpu.VMEM((heads, s, dh), jnp.bfloat16),      # K cache (per batch)
                        pltpu.VMEM((heads, s, dh), jnp.bfloat16)],     # V cache (per batch)
        compiler_params=pltpu.CompilerParams(
            dimension_semantics=("parallel", "arbitrary"),
            vmem_limit_bytes=48 * 1024 * 1024),
        cost_estimate=cost,
    )(text_p, media_p, cum, nums,
      gamma_p, beta_p, wq3, bq3, wk3, bk3, wv3, bv3, wo3, bo_p)

    return out[:, :n, :d]


def reference(text, media, media_locations, params, *, heads, only_preceding):
    """Pure-JAX f32 reference reproducing the PyTorch module semantics."""
    gamma, beta, wq, bq, wk, bk, wv, bv, wo, bo = params
    b, n, d = text.shape
    _, t, m, _ = media.shape
    s = t * m
    dh = d // heads

    mean = text.mean(-1, keepdims=True)
    var = ((text - mean) ** 2).mean(-1, keepdims=True)
    xn = (text - mean) / jnp.sqrt(var + 1e-5) * gamma[0] + beta[0]
    med = media.reshape(b, s, d)

    q = (xn @ wq + bq[0]).reshape(b, n, heads, dh).transpose(0, 2, 1, 3)
    k = (med @ wk + bk[0]).reshape(b, s, heads, dh).transpose(0, 2, 1, 3)
    v = (med @ wv + bv[0]).reshape(b, s, heads, dh).transpose(0, 2, 1, 3)

    scores = jnp.einsum('bhqe,bhke->bhqk', q, k) / math.sqrt(dh)
    cum = jnp.cumsum(media_locations.astype(jnp.int32), -1)
    nums = jnp.repeat(jnp.arange(1, t + 1, dtype=jnp.int32), m)
    if only_preceding:
        allowed = cum[:, :, None] == nums[None, None, :]
    else:
        allowed = cum[:, :, None] >= nums[None, None, :]
    scores = jnp.where(allowed[:, None], scores, -jnp.inf)
    p = jax.nn.softmax(scores, axis=-1)
    o = jnp.einsum('bhqk,bhke->bhqe', p, v).transpose(0, 2, 1, 3).reshape(b, n, d)
    return o @ wo + bo[0]


if __name__ == "__main__":
    b, n, t, m, d, heads = 2, 8, 2, 4, 32, 8

    key = jax.random.PRNGKey(0)
    keys = jax.random.split(key, 12)
    text_tokens = jax.random.normal(keys[0], (b, n, d), jnp.float32)
    media = jax.random.normal(keys[1], (b, t, m, d), jnp.float32)

    # A media frame precedes tokens 0 and 4 (every query row has >=1 allowed key,
    # matching a well-posed PyTorch run).
    media_locations = jnp.zeros((b, n), jnp.bool_).at[:, 0].set(True).at[:, 4].set(True)

    def lin(k_, shape, scale=0.05):
        return jax.random.normal(k_, shape, jnp.float32) * scale

    params = (
        jnp.ones((1, d), jnp.float32),          # layernorm gamma
        jnp.zeros((1, d), jnp.float32),         # layernorm beta
        lin(keys[2], (d, d)), lin(keys[3], (1, d)),   # Wq^T, bq
        lin(keys[4], (d, d)), lin(keys[5], (1, d)),   # Wk^T, bk
        lin(keys[6], (d, d)), lin(keys[7], (1, d)),   # Wv^T, bv
        lin(keys[8], (d, d)), lin(keys[9], (1, d)),   # Wo^T, bo
    )

    out = masked_cross_attention(text_tokens, media, media_locations, params,
                                 heads=heads, only_attend_immediate_media=True)
    out = jax.block_until_ready(out)

    ref = reference(text_tokens, media, media_locations, params,
                    heads=heads, only_preceding=True)
    # bf16 MXU operands + approx reciprocal -> slightly looser tolerance than pure f32.
    np.testing.assert_allclose(np.asarray(out), np.asarray(ref), atol=2e-2, rtol=2e-2)

    print("KERNEL_OK")
</pallas_src>

<mosaic_0001>
module attributes {stable_mosaic.version = 11 : i64} {
  func.func @_mca_kernel(%arg0: i32, %arg1: i32, %arg2: memref<1x8x128xf32, #tpu.memory_space<vmem>>, %arg3: memref<1x8x128xf32, #tpu.memory_space<vmem>>, %arg4: memref<1x8x1xi32, #tpu.memory_space<vmem>>, %arg5: memref<1x8xi32, #tpu.memory_space<vmem>>, %arg6: memref<1x128xf32, #tpu.memory_space<vmem>>, %arg7: memref<1x128xf32, #tpu.memory_space<vmem>>, %arg8: memref<8x128x4xbf16, #tpu.memory_space<vmem>>, %arg9: memref<8x1x4xf32, #tpu.memory_space<vmem>>, %arg10: memref<8x128x4xbf16, #tpu.memory_space<vmem>>, %arg11: memref<8x1x4xf32, #tpu.memory_space<vmem>>, %arg12: memref<8x128x4xbf16, #tpu.memory_space<vmem>>, %arg13: memref<8x1x4xf32, #tpu.memory_space<vmem>>, %arg14: memref<8x4x128xbf16, #tpu.memory_space<vmem>>, %arg15: memref<1x128xf32, #tpu.memory_space<vmem>>, %arg16: memref<1x8x128xf32, #tpu.memory_space<vmem>>, %arg17: memref<8x8x4xbf16, #tpu.memory_space<vmem>>, %arg18: memref<8x8x4xbf16, #tpu.memory_space<vmem>>) attributes {dimension_semantics = [#tpu.dimension_semantics<parallel>, #tpu.dimension_semantics<arbitrary>], iteration_bounds = array<i64: 2, 1>, scalar_prefetch = 0 : i64, scratch_operands = 2 : i64, tpu.core_type = #tpu.core_type<tc>, window_params = [{transform_indices = @transform_0, window_bounds = array<i64: 1, 8, 128>}, {transform_indices = @transform_1, window_bounds = array<i64: 1, 8, 128>}, {transform_indices = @transform_2, window_bounds = array<i64: 1, 8, 1>}, {pipeline_mode = #tpu.pipeline_mode<synchronous>, transform_indices = @transform_3, window_bounds = array<i64: 1, 8>}, {pipeline_mode = #tpu.pipeline_mode<synchronous>, transform_indices = @transform_4, window_bounds = array<i64: 1, 128>}, {pipeline_mode = #tpu.pipeline_mode<synchronous>, transform_indices = @transform_5, window_bounds = array<i64: 1, 128>}, {pipeline_mode = #tpu.pipeline_mode<synchronous>, transform_indices = @transform_6, window_bounds = array<i64: 8, 128, 4>}, {pipeline_mode = #tpu.pipeline_mode<synchronous>, transform_indices = @transform_7, window_bounds = array<i64: 8, 1, 4>}, {pipeline_mode = #tpu.pipeline_mode<synchronous>, transform_indices = @transform_8, window_bounds = array<i64: 8, 128, 4>}, {pipeline_mode = #tpu.pipeline_mode<synchronous>, transform_indices = @transform_9, window_bounds = array<i64: 8, 1, 4>}, {pipeline_mode = #tpu.pipeline_mode<synchronous>, transform_indices = @transform_10, window_bounds = array<i64: 8, 128, 4>}, {pipeline_mode = #tpu.pipeline_mode<synchronous>, transform_indices = @transform_11, window_bounds = array<i64: 8, 1, 4>}, {pipeline_mode = #tpu.pipeline_mode<synchronous>, transform_indices = @transform_12, window_bounds = array<i64: 8, 4, 128>}, {pipeline_mode = #tpu.pipeline_mode<synchronous>, transform_indices = @transform_13, window_bounds = array<i64: 1, 128>}, {transform_indices = @transform_14, window_bounds = array<i64: 1, 8, 128>}]} {
    %c0_i32 = arith.constant 0 : i32
    %0 = arith.cmpi eq, %arg1, %c0_i32 : i32
    %1 = arith.extui %0 : i1 to i32
    %c0_i32_0 = arith.constant 0 : i32
    %2 = arith.cmpi ne, %1, %c0_i32_0 : i32
    scf.if %2 {
      %c0_47 = arith.constant 0 : index
      %c0_48 = arith.constant 0 : index
      %c0_49 = arith.constant 0 : index
      %84 = vector.load %arg3[%c0_47, %c0_48, %c0_49] : memref<1x8x128xf32, #tpu.memory_space<vmem>>, vector<1x8x128xf32>
      %85 = vector.shape_cast %84 : vector<1x8x128xf32> to vector<8x128xf32>
      %86 = arith.truncf %85 : vector<8x128xf32> to vector<8x128xbf16>
      %87 = vector.shape_cast %86 : vector<8x128xbf16> to vector<1x8x128xbf16>
      %88 = vector.shape_cast %87 : vector<1x8x128xbf16> to vector<1x8x128xbf16>
      %89 = vector.broadcast %88 : vector<1x8x128xbf16> to vector<8x8x128xbf16>
      %c0_50 = arith.constant 0 : index
      %c0_51 = arith.constant 0 : index
      %c0_52 = arith.constant 0 : index
      %90 = vector.load %arg10[%c0_50, %c0_51, %c0_52] : memref<8x128x4xbf16, #tpu.memory_space<vmem>>, vector<8x128x4xbf16>
      "tpu.trace_start"() <{level = 10 : i32, message = "hsd,hdf->hsf"}> : () -> ()
      %cst_53 = arith.constant dense<0.000000e+00> : vector<8x8x4xf32>
      %91 = tpu.matmul %89, %90, %cst_53 {dimension_numbers = #tpu.dot_dimension_numbers<[2], [1], [1], [2], [0, 0, 0, 1, 1, 2], [0], [0]>} : vector<8x8x128xbf16>, vector<8x128x4xbf16>, vector<8x8x4xf32> -> vector<8x8x4xf32>
      "tpu.trace_stop"() : () -> ()
      %c0_54 = arith.constant 0 : index
      %c0_55 = arith.constant 0 : index
      %c0_56 = arith.constant 0 : index
      %92 = vector.load %arg11[%c0_54, %c0_55, %c0_56] : memref<8x1x4xf32, #tpu.memory_space<vmem>>, vector<8x1x4xf32>
      %93 = vector.broadcast %92 : vector<8x1x4xf32> to vector<8x8x4xf32>
      %94 = arith.addf %91, %93 : vector<8x8x4xf32>
      %c0_57 = arith.constant 0 : index
      %c0_58 = arith.constant 0 : index
      %c0_59 = arith.constant 0 : index
      %95 = vector.load %arg12[%c0_57, %c0_58, %c0_59] : memref<8x128x4xbf16, #tpu.memory_space<vmem>>, vector<8x128x4xbf16>
      "tpu.trace_start"() <{level = 10 : i32, message = "hsd,hdf->hsf"}> : () -> ()
      %cst_60 = arith.constant dense<0.000000e+00> : vector<8x8x4xf32>
      %96 = tpu.matmul %89, %95, %cst_60 {dimension_numbers = #tpu.dot_dimension_numbers<[2], [1], [1], [2], [0, 0, 0, 1, 1, 2], [0], [0]>} : vector<8x8x128xbf16>, vector<8x128x4xbf16>, vector<8x8x4xf32> -> vector<8x8x4xf32>
      "tpu.trace_stop"() : () -> ()
      %c0_61 = arith.constant 0 : index
      %c0_62 = arith.constant 0 : index
      %c0_63 = arith.constant 0 : index
      %97 = vector.load %arg13[%c0_61, %c0_62, %c0_63] : memref<8x1x4xf32, #tpu.memory_space<vmem>>, vector<8x1x4xf32>
      %98 = vector.broadcast %97 : vector<8x1x4xf32> to vector<8x8x4xf32>
      %99 = arith.addf %96, %98 : vector<8x8x4xf32>
      %100 = arith.truncf %94 : vector<8x8x4xf32> to vector<8x8x4xbf16>
      %c0_64 = arith.constant 0 : index
      %c0_65 = arith.constant 0 : index
      %c0_66 = arith.constant 0 : index
      %101 = vector.load %arg17[%c0_64, %c0_65, %c0_66] : memref<8x8x4xbf16, #tpu.memory_space<vmem>>, vector<8x8x4xbf16>
      tpu.vector_store %arg17[%c0_64, %c0_65, %c0_66], %100 {strides = array<i32>} : memref<8x8x4xbf16, #tpu.memory_space<vmem>>, vector<8x8x4xbf16>,
      %102 = arith.truncf %99 : vector<8x8x4xf32> to vector<8x8x4xbf16>
      %c0_67 = arith.constant 0 : index
      %c0_68 = arith.constant 0 : index
      %c0_69 = arith.constant 0 : index
      %103 = vector.load %arg18[%c0_67, %c0_68, %c0_69] : memref<8x8x4xbf16, #tpu.memory_space<vmem>>, vector<8x8x4xbf16>
      tpu.vector_store %arg18[%c0_67, %c0_68, %c0_69], %102 {strides = array<i32>} : memref<8x8x4xbf16, #tpu.memory_space<vmem>>, vector<8x8x4xbf16>,
    } else {
    }
    %c0 = arith.constant 0 : index
    %c0_1 = arith.constant 0 : index
    %c0_2 = arith.constant 0 : index
    %3 = vector.load %arg2[%c0, %c0_1, %c0_2] : memref<1x8x128xf32, #tpu.memory_space<vmem>>, vector<1x8x128xf32>
    %4 = vector.shape_cast %3 : vector<1x8x128xf32> to vector<8x128xf32>
    %cst = arith.constant dense<0.000000e+00> : vector<8xf32>
    %5 = vector.multi_reduction <add>, %4, %cst [1] : vector<8x128xf32> to vector<8xf32>
    %6 = vector.shape_cast %5 : vector<8xf32> to vector<8x1xf32>
    %cst_3 = arith.constant 3.125000e-02 : f32
    %7 = vector.broadcast %cst_3 : f32 to vector<8x1xf32>
    %8 = arith.mulf %6, %7 : vector<8x1xf32>
    %9 = arith.mulf %4, %4 : vector<8x128xf32>
    %cst_4 = arith.constant dense<0.000000e+00> : vector<8xf32>
    %10 = vector.multi_reduction <add>, %9, %cst_4 [1] : vector<8x128xf32> to vector<8xf32>
    %11 = vector.shape_cast %10 : vector<8xf32> to vector<8x1xf32>
    %cst_5 = arith.constant 3.125000e-02 : f32
    %12 = vector.broadcast %cst_5 : f32 to vector<8x1xf32>
    %13 = arith.mulf %11, %12 : vector<8x1xf32>
    %14 = arith.mulf %8, %8 : vector<8x1xf32>
    %15 = arith.subf %13, %14 : vector<8x1xf32>
    %16 = vector.broadcast %8 : vector<8x1xf32> to vector<8x128xf32>
    %17 = arith.subf %4, %16 : vector<8x128xf32>
    %cst_6 = arith.constant 9.99999974E-6 : f32
    %18 = vector.broadcast %cst_6 : f32 to vector<8x1xf32>
    %19 = arith.addf %15, %18 : vector<8x1xf32>
    %20 = math.rsqrt %19 : vector<8x1xf32>
    %21 = vector.broadcast %20 : vector<8x1xf32> to vector<8x128xf32>
    %22 = arith.mulf %17, %21 : vector<8x128xf32>
    %c0_7 = arith.constant 0 : index
    %c0_8 = arith.constant 0 : index
    %23 = vector.load %arg6[%c0_7, %c0_8] : memref<1x128xf32, #tpu.memory_space<vmem>>, vector<1x128xf32>
    %24 = vector.broadcast %23 : vector<1x128xf32> to vector<8x128xf32>
    %25 = arith.mulf %22, %24 : vector<8x128xf32>
    %c0_9 = arith.constant 0 : index
    %c0_10 = arith.constant 0 : index
    %26 = vector.load %arg7[%c0_9, %c0_10] : memref<1x128xf32, #tpu.memory_space<vmem>>, vector<1x128xf32>
    %27 = vector.broadcast %26 : vector<1x128xf32> to vector<8x128xf32>
    %28 = arith.addf %25, %27 : vector<8x128xf32>
    %29 = arith.truncf %28 : vector<8x128xf32> to vector<8x128xbf16>
    %30 = vector.shape_cast %29 : vector<8x128xbf16> to vector<1x8x128xbf16>
    %31 = vector.shape_cast %30 : vector<1x8x128xbf16> to vector<1x8x128xbf16>
    %32 = vector.broadcast %31 : vector<1x8x128xbf16> to vector<8x8x128xbf16>
    %c0_11 = arith.constant 0 : index
    %c0_12 = arith.constant 0 : index
    %c0_13 = arith.constant 0 : index
    %33 = vector.load %arg8[%c0_11, %c0_12, %c0_13] : memref<8x128x4xbf16, #tpu.memory_space<vmem>>, vector<8x128x4xbf16>
    "tpu.trace_start"() <{level = 10 : i32, message = "hnd,hdf->hnf"}> : () -> ()
    %cst_14 = arith.constant dense<0.000000e+00> : vector<8x8x4xf32>
    %34 = tpu.matmul %32, %33, %cst_14 {dimension_numbers = #tpu.dot_dimension_numbers<[2], [1], [1], [2], [0, 0, 0, 1, 1, 2], [0], [0]>} : vector<8x8x128xbf16>, vector<8x128x4xbf16>, vector<8x8x4xf32> -> vector<8x8x4xf32>
    "tpu.trace_stop"() : () -> ()
    %c0_15 = arith.constant 0 : index
    %c0_16 = arith.constant 0 : index
    %c0_17 = arith.constant 0 : index
    %35 = vector.load %arg9[%c0_15, %c0_16, %c0_17] : memref<8x1x4xf32, #tpu.memory_space<vmem>>, vector<8x1x4xf32>
    %36 = vector.broadcast %35 : vector<8x1x4xf32> to vector<8x8x4xf32>
    %37 = arith.addf %34, %36 : vector<8x8x4xf32>
    %38 = arith.truncf %37 : vector<8x8x4xf32> to vector<8x8x4xbf16>
    %c0_18 = arith.constant 0 : index
    %c0_19 = arith.constant 0 : index
    %c0_20 = arith.constant 0 : index
    %39 = vector.load %arg4[%c0_18, %c0_19, %c0_20] : memref<1x8x1xi32, #tpu.memory_space<vmem>>, vector<1x8x1xi32>
    %40 = vector.shape_cast %39 : vector<1x8x1xi32> to vector<8x1xi32>
    %c0_21 = arith.constant 0 : index
    %c0_22 = arith.constant 0 : index
    %41 = vector.load %arg5[%c0_21, %c0_22] : memref<1x8xi32, #tpu.memory_space<vmem>>, vector<1x8xi32>
    %42 = vector.broadcast %40 : vector<8x1xi32> to vector<8x8xi32>
    %43 = vector.broadcast %41 : vector<1x8xi32> to vector<8x8xi32>
    %44 = arith.cmpi eq, %42, %43 : vector<8x8xi32>
    %cst_23 = arith.constant 0.000000e+00 : f32
    %cst_24 = arith.constant -1.000000e+30 : f32
    %45 = vector.broadcast %cst_23 : f32 to vector<8x8xf32>
    %46 = vector.broadcast %cst_24 : f32 to vector<8x8xf32>
    %47 = arith.select %44, %45, %46 : vector<8x8xi1>, vector<8x8xf32>
    %cst_25 = arith.constant dense<0xFF800000> : vector<8xf32>
    %48 = vector.multi_reduction <maximumf>, %47, %cst_25 [1] : vector<8x8xf32> to vector<8xf32>
    %49 = vector.shape_cast %48 : vector<8xf32> to vector<8x1xf32>
    %cst_26 = arith.constant 0.000000e+00 : f32
    %50 = vector.broadcast %cst_26 : f32 to vector<8x1xf32>
    %51 = arith.cmpf oeq, %49, %50 : vector<8x1xf32>
    %52 = arith.extui %51 : vector<8x1xi1> to vector<8x1xi32>
    %53 = arith.sitofp %52 : vector<8x1xi32> to vector<8x1xf32>
    %c0_27 = arith.constant 0 : index
    %c0_28 = arith.constant 0 : index
    %c0_29 = arith.constant 0 : index
    %54 = vector.load %arg17[%c0_27, %c0_28, %c0_29] : memref<8x8x4xbf16, #tpu.memory_space<vmem>>, vector<8x8x4xbf16>
    %c0_30 = arith.constant 0 : index
    %c0_31 = arith.constant 0 : index
    %c0_32 = arith.constant 0 : index
    %55 = vector.load %arg18[%c0_30, %c0_31, %c0_32] : memref<8x8x4xbf16, #tpu.memory_space<vmem>>, vector<8x8x4xbf16>
    "tpu.trace_start"() <{level = 10 : i32, message = "hqf,hkf->hqk"}> : () -> ()
    %cst_33 = arith.constant dense<0.000000e+00> : vector<8x8x8xf32>
    %56 = tpu.matmul %38, %54, %cst_33 {dimension_numbers = #tpu.dot_dimension_numbers<[2], [2], [1], [1], [0, 0, 0, 1, 1, 1], [0], [0]>} : vector<8x8x4xbf16>, vector<8x8x4xbf16>, vector<8x8x8xf32> -> vector<8x8x8xf32>
    "tpu.trace_stop"() : () -> ()
    %57 = vector.shape_cast %47 : vector<8x8xf32> to vector<1x8x8xf32>
    %58 = vector.broadcast %57 : vector<1x8x8xf32> to vector<8x8x8xf32>
    %59 = arith.addf %56, %58 : vector<8x8x8xf32>
    %cst_34 = arith.constant dense<0xFF800000> : vector<8x8xf32>
    %60 = vector.multi_reduction <maximumf>, %59, %cst_34 [2] : vector<8x8x8xf32> to vector<8x8xf32>
    %61 = vector.shape_cast %60 : vector<8x8xf32> to vector<8x8x1xf32>
    %62 = vector.broadcast %61 : vector<8x8x1xf32> to vector<8x8x8xf32>
    %63 = arith.subf %59, %62 : vector<8x8x8xf32>
    %64 = math.exp %63 : vector<8x8x8xf32>
    %cst_35 = arith.constant dense<0.000000e+00> : vector<8x8xf32>
    %65 = vector.multi_reduction <add>, %64, %cst_35 [2] : vector<8x8x8xf32> to vector<8x8xf32>
    %66 = vector.shape_cast %65 : vector<8x8xf32> to vector<8x8x1xf32>
    %67 = arith.truncf %64 : vector<8x8x8xf32> to vector<8x8x8xbf16>
    "tpu.trace_start"() <{level = 10 : i32, message = "hqk,hkf->hqf"}> : () -> ()
    %cst_36 = arith.constant dense<0.000000e+00> : vector<8x8x4xf32>
    %68 = tpu.matmul %67, %55, %cst_36 {dimension_numbers = #tpu.dot_dimension_numbers<[2], [1], [1], [2], [0, 0, 0, 1, 1, 2], [0], [0]>} : vector<8x8x8xbf16>, vector<8x8x4xbf16>, vector<8x8x4xf32> -> vector<8x8x4xf32>
    "tpu.trace_stop"() : () -> ()
    %69 = tpu.reciprocal %66 {approx = true} : vector<8x8x1xf32> -> vector<8x8x1xf32>
    %70 = vector.broadcast %69 : vector<8x8x1xf32> to vector<8x8x4xf32>
    %71 = arith.mulf %68, %70 : vector<8x8x4xf32>
    %72 = arith.truncf %71 : vector<8x8x4xf32> to vector<8x8x4xbf16>
    %c0_37 = arith.constant 0 : index
    %c0_38 = arith.constant 0 : index
    %c0_39 = arith.constant 0 : index
    %73 = vector.load %arg14[%c0_37, %c0_38, %c0_39] : memref<8x4x128xbf16, #tpu.memory_space<vmem>>, vector<8x4x128xbf16>
    "tpu.trace_start"() <{level = 10 : i32, message = "hqf,hfd->hqd"}> : () -> ()
    %cst_40 = arith.constant dense<0.000000e+00> : vector<8x8x128xf32>
    %74 = tpu.matmul %72, %73, %cst_40 {dimension_numbers = #tpu.dot_dimension_numbers<[2], [1], [1], [2], [0, 0, 0, 1, 1, 2], [0], [0]>} : vector<8x8x4xbf16>, vector<8x4x128xbf16>, vector<8x8x128xf32> -> vector<8x8x128xf32>
    "tpu.trace_stop"() : () -> ()
    %cst_41 = arith.constant dense<0.000000e+00> : vector<8x128xf32>
    %75 = vector.multi_reduction <add>, %74, %cst_41 [0] : vector<8x8x128xf32> to vector<8x128xf32>
    %c0_42 = arith.constant 0 : index
    %c0_43 = arith.constant 0 : index
    %76 = vector.load %arg15[%c0_42, %c0_43] : memref<1x128xf32, #tpu.memory_space<vmem>>, vector<1x128xf32>
    %77 = vector.broadcast %76 : vector<1x128xf32> to vector<8x128xf32>
    %78 = arith.addf %75, %77 : vector<8x128xf32>
    %79 = vector.broadcast %53 : vector<8x1xf32> to vector<8x128xf32>
    %80 = arith.mulf %78, %79 : vector<8x128xf32>
    %c0_44 = arith.constant 0 : index
    %c0_45 = arith.constant 0 : index
    %c0_46 = arith.constant 0 : index
    %81 = vector.load %arg16[%c0_44, %c0_45, %c0_46] : memref<1x8x128xf32, #tpu.memory_space<vmem>>, vector<1x8x128xf32>
    %82 = vector.shape_cast %81 : vector<1x8x128xf32> to vector<8x128xf32>
    %83 = vector.shape_cast %80 : vector<8x128xf32> to vector<1x8x128xf32>
    tpu.vector_store %arg16[%c0_44, %c0_45, %c0_46], %83 {strides = array<i32>} : memref<1x8x128xf32, #tpu.memory_space<vmem>>, vector<1x8x128xf32>,
    return
  }
  func.func @transform_0(%arg0: i32, %arg1: i32) -> (i32, i32, i32) {
    %c0_i32 = arith.constant 0 : i32
    %c0_i32_0 = arith.constant 0 : i32
    return %arg0, %arg1, %c0_i32 : i32, i32, i32
  }
  func.func @transform_1(%arg0: i32, %arg1: i32) -> (i32, i32, i32) {
    %c0_i32 = arith.constant 0 : i32
    %c0_i32_0 = arith.constant 0 : i32
    %c0_i32_1 = arith.constant 0 : i32
    return %arg0, %c0_i32, %c0_i32_0 : i32, i32, i32
  }
  func.func @transform_2(%arg0: i32, %arg1: i32) -> (i32, i32, i32) {
    %c0_i32 = arith.constant 0 : i32
    %c0_i32_0 = arith.constant 0 : i32
    return %arg0, %arg1, %c0_i32 : i32, i32, i32
  }
  func.func @transform_3(%arg0: i32, %arg1: i32) -> (i32, i32) {
    %c0_i32 = arith.constant 0 : i32
    %c0_i32_0 = arith.constant 0 : i32
    %c0_i32_1 = arith.constant 0 : i32
    return %c0_i32, %c0_i32_0 : i32, i32
  }
  func.func @transform_4(%arg0: i32, %arg1: i32) -> (i32, i32) {
    %c0_i32 = arith.constant 0 : i32
    %c0_i32_0 = arith.constant 0 : i32
    %c0_i32_1 = arith.constant 0 : i32
    return %c0_i32, %c0_i32_0 : i32, i32
  }
  func.func @transform_5(%arg0: i32, %arg1: i32) -> (i32, i32) {
    %c0_i32 = arith.constant 0 : i32
    %c0_i32_0 = arith.constant 0 : i32
    %c0_i32_1 = arith.constant 0 : i32
    return %c0_i32, %c0_i32_0 : i32, i32
  }
  func.func @transform_6(%arg0: i32, %arg1: i32) -> (i32, i32, i32) {
    %c0_i32 = arith.constant 0 : i32
    %c0_i32_0 = arith.constant 0 : i32
    %c0_i32_1 = arith.constant 0 : i32
    %c0_i32_2 = arith.constant 0 : i32
    return %c0_i32, %c0_i32_0, %c0_i32_1 : i32, i32, i32
  }
  func.func @transform_7(%arg0: i32, %arg1: i32) -> (i32, i32, i32) {
    %c0_i32 = arith.constant 0 : i32
    %c0_i32_0 = arith.constant 0 : i32
    %c0_i32_1 = arith.constant 0 : i32
    %c0_i32_2 = arith.constant 0 : i32
    return %c0_i32, %c0_i32_0, %c0_i32_1 : i32, i32, i32
  }
  func.func @transform_8(%arg0: i32, %arg1: i32) -> (i32, i32, i32) {
    %c0_i32 = arith.constant 0 : i32
    %c0_i32_0 = arith.constant 0 : i32
    %c0_i32_1 = arith.constant 0 : i32
    %c0_i32_2 = arith.constant 0 : i32
    return %c0_i32, %c0_i32_0, %c0_i32_1 : i32, i32, i32
  }
  func.func @transform_9(%arg0: i32, %arg1: i32) -> (i32, i32, i32) {
    %c0_i32 = arith.constant 0 : i32
    %c0_i32_0 = arith.constant 0 : i32
    %c0_i32_1 = arith.constant 0 : i32
    %c0_i32_2 = arith.constant 0 : i32
    return %c0_i32, %c0_i32_0, %c0_i32_1 : i32, i32, i32
  }
  func.func @transform_10(%arg0: i32, %arg1: i32) -> (i32, i32, i32) {
    %c0_i32 = arith.constant 0 : i32
    %c0_i32_0 = arith.constant 0 : i32
    %c0_i32_1 = arith.constant 0 : i32
    %c0_i32_2 = arith.constant 0 : i32
    return %c0_i32, %c0_i32_0, %c0_i32_1 : i32, i32, i32
  }
  func.func @transform_11(%arg0: i32, %arg1: i32) -> (i32, i32, i32) {
    %c0_i32 = arith.constant 0 : i32
    %c0_i32_0 = arith.constant 0 : i32
    %c0_i32_1 = arith.constant 0 : i32
    %c0_i32_2 = arith.constant 0 : i32
    return %c0_i32, %c0_i32_0, %c0_i32_1 : i32, i32, i32
  }
  func.func @transform_12(%arg0: i32, %arg1: i32) -> (i32, i32, i32) {
    %c0_i32 = arith.constant 0 : i32
    %c0_i32_0 = arith.constant 0 : i32
    %c0_i32_1 = arith.constant 0 : i32
    %c0_i32_2 = arith.constant 0 : i32
    return %c0_i32, %c0_i32_0, %c0_i32_1 : i32, i32, i32
  }
  func.func @transform_13(%arg0: i32, %arg1: i32) -> (i32, i32) {
    %c0_i32 = arith.constant 0 : i32
    %c0_i32_0 = arith.constant 0 : i32
    %c0_i32_1 = arith.constant 0 : i32
    return %c0_i32, %c0_i32_0 : i32, i32
  }
  func.func @transform_14(%arg0: i32, %arg1: i32) -> (i32, i32, i32) {
    %c0_i32 = arith.constant 0 : i32
    %c0_i32_0 = arith.constant 0 : i32
    return %arg0, %arg1, %c0_i32 : i32, i32, i32
  }
}

</mosaic_0001>

<bundles_post_ra>
// kernel: tpu_custom_call.1
= control target key start
LH: loop header
LB: loop body
LE: loop exit
PB: predicated region body
PF: predicated region fallthrough
CT: control target
= control target key end

     0   :  { %s7526_s0 = inlined_call_operand.vmem [shape: f32[2,8,128], index: 0, kind: input, shape index: {}]   ;;  %s7527_s1 = inlined_call_operand.vmem [shape: f32[2,8,128], index: 1, kind: input, shape index: {}]   ;;  %s7528_s2 = inlined_call_operand.vmem [shape: s32[2,8,1], index: 2, kind: input, shape index: {}]   ;;  %s7529_s3 = inlined_call_operand.vmem [shape: s32[1,8], index: 3, kind: input, shape index: {}]   ;;  %s7530_s4 = inlined_call_operand.vmem [shape: f32[1,128], index: 4, kind: input, shape index: {}]   ;;  %s7531_s5 = inlined_call_operand.vmem [shape: f32[1,128], index: 5, kind: input, shape index: {}]   ;;  %s7532_s6 = inlined_call_operand.vmem [shape: bf16[8,128,4], index: 6, kind: input, shape index: {}]   ;;  %s7533_s7 = inlined_call_operand.vmem [shape: f32[8,1,4], index: 7, kind: input, shape index: {}]   ;;  %s7534_s8 = inlined_call_operand.vmem [shape: bf16[8,128,4], index: 8, kind: input, shape index: {}]   ;;  %s7535_s9 = inlined_call_operand.vmem [shape: f32[8,1,4], index: 9, kind: input, shape index: {}]   ;;  %s7536_s10 = inlined_call_operand.vmem [shape: bf16[8,128,4], index: 10, kind: input, shape index: {}]   ;;  %s7537_s11 = inlined_call_operand.vmem [shape: f32[8,1,4], index: 11, kind: input, shape index: {}]   ;;  %s7538_s12 = inlined_call_operand.vmem [shape: bf16[8,4,128], index: 12, kind: input, shape index: {}]   ;;  %s7539_s13 = inlined_call_operand.vmem [shape: f32[1,128], index: 13, kind: input, shape index: {}]   ;;  %s7540_s14 = inlined_call_operand.hbm [shape: f32[2,8,128], index: 14, kind: output, shape index: {}]  }
   0x1   :  { %7544 = sst [smem:[#allocation11_spill]] %s7526_s0 }
   0x2   :  { %19 = vsyncpa [#allocation5], 0 }
   0x3   :  { %21 = vsyncpa [#allocation5 + $0x1], 0  ;;  %s6253_s29 = smov 0   ;;  %s6255_s30 = smov 0  }
   0x4   :  { %s6257_s15 = smov 0   ;;  %s6259_s16 = smov 0  }
   0x5   :  { %s6261_s17 = smov 0   ;;  %s6263_s18 = smov 0  }
   0x6 LB: > { %7545 = sst [smem:[#allocation7_spill]] %s6159_s15  ;;  %s4659_s19 = sadd.s32 4294967295, %s6171_s18   ;;  %s6171_s18 = sphi %s6263_s18, %s27_s18   ;;  %s6167_s17 = sphi %s6261_s17, %s7555_s17   ;;  %s6163_s16 = sphi %s6259_s16, %s7554_s16   ;;  %s6159_s15 = sphi %s6257_s15, %s7553_s15   ;;  %s6155_s30 = sphi %s6255_s30, %s7557_s30   ;;  %s6151_s29 = sphi %s6253_s29, %s7556_s29  }
   0x7   : > { %7546 = sst [smem:[#allocation8_spill]] %s6167_s17  ;;  %s4660_s20 = sadd.s32 4294967294, %s6171_s18  }
   0x8   : > { %s39_s21 = sadd.s32 1, %s6167_s17  ;;  %s361_s22 = sadd.s32 1, %s6159_s15 }
   0x9   : > { %p41_p0 = scmp.ge.s32.totalorder %s39_s21, 2  ;;  %p371_p1 = scmp.ne.s32.totalorder %s6159_s15, %s6155_s30 }
   0xa   : > { %p372_p2 = scmp.eq.s32.totalorder %s4659_s19, 1  ;;  %p377_p3 = scmp.ne.s32.totalorder %s6155_s30, %s6151_s29 }
   0xb   : > { %s7559_s21 = smov (%p41_p0, %s39_s21), 0  ;;  %p378_p5 = scmp.eq.s32.totalorder %s4660_s20, 1 }
   0xc   : > { %7547 = sst [smem:[#allocation9_spill]] %s7559_s21  ;;  %p6293_p4 = por %p372_p2, %p371_p1 }
   0xd   : > { %s356_s24 = ssub.s32 %s6167_s17, %s7559_s21  ;;  %p4663_p6 = scmp.ge.s32.totalorder %s6171_s18, 1 }
   0xe   : > { %p359_p7 = scmp.eq.s32.totalorder %s356_s24, 0  ;;  %p6300_p8 = por %p378_p5, %p377_p3 }
   0xf   : > { %p456_p9 = scmp.lt.s32.totalorder %s6171_s18, 3 }
  0x10   : > { %s6306_s26 = scalar_select %p359_p7, %s6159_s15, %s361_s22  }
  0x11   : > { %p457_p10 = pnand %p4663_p6, %p456_p9 }
  0x12   : > { %7550 = sst [smem:[#allocation10_spill]] %s6306_s26  ;;  %v5866_v0 = vld [vmem:[%s7534_s8] sm:$0xff] (!%p457_p10)   ;;  %v6173_v1 = vmov (!%p457_p10), 0.0   ;;  %v5868_v3 = vld [vmem:[%s7534_s8 + $0x8] sm:$0xff] (!%p457_p10)   ;;  %vm6174_vm0 = vmmov (!%p457_p10), 0   ;;  %v5870_v5 = vld [vmem:[%s7534_s8 + $0x10] sm:$0xff] (!%p457_p10)  }
  0x13   : > { %460 = sbr.rel (%p457_p10) target bundleno = 1445 (0x5a5), region = 76  ;;  %5181 = vmatprep.subr.bf16.mxu0 (!%p457_p10), %v6173_v1  ;;  %5201 = vmatprep.subr.bf16.mxu1 (!%p457_p10), %v6173_v1  ;;  %v5867_v2 = vld [vmem:[%s7534_s8 + $0x40] sm:$0xff] (!%p457_p10)   ;;  %v5869_v4 = vld [vmem:[%s7534_s8 + $0x48] sm:$0xff] (!%p457_p10)   ;;  %v5871_v6 = vld [vmem:[%s7534_s8 + $0x50] sm:$0xff] (!%p457_p10)   ;;  %p515_p11 = scmp.lt.s32.totalorder (!%p457_p10), %s6163_s16, 1  ;;  %vm2324_vm1 = vcmask (!%p457_p10), 27648  }
  0x14   : > { %5182 = vmatpush3.bf16.msra.mxu0 (!%p457_p10), %v5866_v0  ;;  %5197 = vmatprep.mubr.msk.bf16.mxu0 (!%p457_p10), %vm6174_vm0, %v6173_v1  ;;  %v5872_v7 = vld [vmem:[%s7534_s8 + $0x18] sm:$0xff] (!%p457_p10)   ;;  %v5874_v9 = vld [vmem:[%s7534_s8 + $0x20] sm:$0xff] (!%p457_p10)   ;;  %v5876_v11 = vld [vmem:[%s7534_s8 + $0x28] sm:$0xff] (!%p457_p10)   ;;  %s7551_s0 = sld [smem:[#allocation11_spill]] (!%p457_p10)  ;;  %vm3310_vm2 = vcmask (!%p457_p10), 31744   ;;  %vm3762_vm3 = vcmask (!%p457_p10), 1043456  }
  0x15   : > { %5202 = vmatpush3.bf16.msra.mxu1 (!%p457_p10), %v5867_v2  ;;  %5183 = vmatprep.subr.bf16.mxu0 (!%p457_p10), %v6173_v1  ;;  %v5873_v8 = vld [vmem:[%s7534_s8 + $0x58] sm:$0xff] (!%p457_p10)   ;;  %v5875_v10 = vld [vmem:[%s7534_s8 + $0x60] sm:$0xff] (!%p457_p10)   ;;  %v5877_v12 = vld [vmem:[%s7534_s8 + $0x68] sm:$0xff] (!%p457_p10)   ;;  %vm3287_vm5 = vcmask (!%p457_p10), 64512   ;;  %vm4163_vm6 = vcmask (!%p457_p10), 1041408   ;;  %s512_s15 = sand.u32 (!%p457_p10), 1, %s6155_s30  }
  0x16   : > { %5203 = vmatprep.subr.bf16.mxu1 (!%p457_p10), %v6173_v1  ;;  %5217 = vmatprep.mubr.msk.bf16.mxu1 (!%p457_p10), %vm6174_vm0, %v6173_v1  ;;  %v5878_v13 = vld [vmem:[%s7534_s8 + $0x30] sm:$0xff] (!%p457_p10)   ;;  %v5880_v15 = vld [vmem:[%s7534_s8 + $0x38] sm:$0xff] (!%p457_p10)   ;;  %v5882_v19 = vld [vmem:[%s7534_s8 + $0x80] sm:$0xff] (!%p457_p10)   ;;  %s4664_s21 = sshll.u32 (!%p457_p10), %s512_s15, 3 }
  0x17   : > { %v5879_v14 = vld [vmem:[%s7534_s8 + $0x70] sm:$0xff] (!%p457_p10)   ;;  %v5881_v17 = vld [vmem:[%s7534_s8 + $0x78] sm:$0xff] (!%p457_p10)   ;;  %v5883_v20 = vld [vmem:[%s7534_s8 + $0xc0] sm:$0xff] (!%p457_p10)  }
  0x18   : > { %5184 = vmatpush3.bf16.msra.mxu0 (!%p457_p10), %v5868_v3  ;;  %v5884_v21 = vld [vmem:[%s7534_s8 + $0x88] sm:$0xff] (!%p457_p10)   ;;  %v5886_v23 = vld [vmem:[%s7534_s8 + $0x90] sm:$0xff] (!%p457_p10)   ;;  %v5888_v25 = vld [vmem:[%s7534_s8 + $0x98] sm:$0xff] (!%p457_p10)  }
  0x19   : > { %5204 = vmatpush3.bf16.msra.mxu1 (!%p457_p10), %v5869_v4  ;;  %5185 = vmatprep.subr.bf16.mxu0 (!%p457_p10), %v6173_v1  ;;  %v5885_v22 = vld [vmem:[%s7534_s8 + $0xc8] sm:$0xff] (!%p457_p10)   ;;  %v5887_v24 = vld [vmem:[%s7534_s8 + $0xd0] sm:$0xff] (!%p457_p10)   ;;  %v5889_v26 = vld [vmem:[%s7534_s8 + $0xd8] sm:$0xff] (!%p457_p10)  }
  0x1a   : > { %5205 = vmatprep.subr.bf16.mxu1 %v6173_v1  ;;  %s516_s22 = scalar_select %p515_p11, %s6163_s16, 1  ;;  %v5890_v27 = vld [vmem:[%s7534_s8 + $0xa0] sm:$0xff]   ;;  %v5892_v29 = vld [vmem:[%s7534_s8 + $0xa8] sm:$0xff]   ;;  %v5894_v33 = vld [vmem:[%s7534_s8 + $0xb0] sm:$0xff]  }
  0x1b   : > { %v5891_v28 = vld [vmem:[%s7534_s8 + $0xe0] sm:$0xff]   ;;  %v5893_v30 = vld [vmem:[%s7534_s8 + $0xe8] sm:$0xff]   ;;  %v5895_v34 = vld [vmem:[%s7534_s8 + $0xf0] sm:$0xff]  }
  0x1c   : > { %5186 = vmatpush3.bf16.msra.mxu0 %v5870_v5  ;;  %s6362_s17 = sshll.u32 %s516_s22, 3  ;;  %v5896_v35 = vld [vmem:[%s7534_s8 + $0xb8] sm:$0xff]   ;;  %v5898_v37 = vld [vmem:[%s7534_s8 + $0x100] sm:$0xff]   ;;  %v5900_v39 = vld [vmem:[%s7534_s8 + $0x108] sm:$0xff]   ;;  %s4914_s22 = sshll.u32 %s6163_s16, 7 }
  0x1d   : > { %5206 = vmatpush3.bf16.msra.mxu1 %v5871_v6  ;;  %5187 = vmatprep.subr.bf16.mxu0 %v6173_v1  ;;  %s525_s19 = scalar_lea.vmem %s7527_s1, %s6362_s17  ;;  %s6436_s28 = scalar_lea.vmem %s7551_s0, %s6362_s17  ;;  %v5897_v36 = vld [vmem:[%s7534_s8 + $0xf8] sm:$0xff]   ;;  %v5899_v38 = vld [vmem:[%s7534_s8 + $0x140] sm:$0xff]   ;;  %v5901_v40 = vld [vmem:[%s7534_s8 + $0x148] sm:$0xff]  }
  0x1e   : > { %5207 = vmatprep.subr.bf16.mxu1 %v6173_v1  ;;  %v538_v16 = vld [vmem:[%s525_s19] sm:$0xff]  ;;  %v5902_v41 = vld [vmem:[%s7534_s8 + $0x110] sm:$0xff]   ;;  %v5904_v43 = vld [vmem:[%s7534_s8 + $0x118] sm:$0xff]   ;;  %s532_s20 = scalar_lea.vmem %s7528_s2, %s6362_s17  ;;  %s7479_s0 = scalar_lea.hbm %s7540_s14, %s4914_s22 }
  0x1f   : > { %v6384_v18 = vpack.c.bf16 %v538_v16, %v538_v16  ;;  %v2349_v31 = vld [vmem:[%s6436_s28] sm:$0xff]  ;;  %v5903_v42 = vld [vmem:[%s7534_s8 + $0x150] sm:$0xff]   ;;  %v5905_v44 = vld [vmem:[%s7534_s8 + $0x158] sm:$0xff]   ;;  %s4547_s17 = scalar_lea.sflag [#allocation5], %s512_s15 }
  0x20   : > { %5188 = vmatpush3.bf16.msra.mxu0 %v5872_v7  ;;  %2350 = vadd.xlane.f32.xlu0 %v2349_v31  ;;  %v2353_v32 = vmul.f32 %v2349_v31, %v2349_v31  ;;  %v5906_v45 = vld [vmem:[%s7534_s8 + $0x120] sm:$0xff]   ;;  %v5908_v47 = vld [vmem:[%s7534_s8 + $0x128] sm:$0xff]   ;;  %v5910_v49 = vld [vmem:[%s7534_s8 + $0x130] sm:$0xff]  }
  0x21   : > { %5208 = vmatpush3.bf16.msra.mxu1 %v5873_v8  ;;  %5189 = vmatprep.subr.bf16.mxu0 %v6173_v1  ;;  %v5907_v46 = vld [vmem:[%s7534_s8 + $0x160] sm:$0xff]   ;;  %v5909_v48 = vld [vmem:[%s7534_s8 + $0x168] sm:$0xff]   ;;  %v5911_v50 = vld [vmem:[%s7534_s8 + $0x170] sm:$0xff]  }
  0x22   : > { %5209 = vmatprep.subr.bf16.mxu1 %v6173_v1  ;;  %v5912_v51 = vld [vmem:[%s7534_s8 + $0x138] sm:$0xff]   ;;  %v5914_v53 = vld [vmem:[%s7534_s8 + $0x180] sm:$0xff]   ;;  %v5916_v55 = vld [vmem:[%s7534_s8 + $0x188] sm:$0xff]  }
  0x23   : > { %v5913_v52 = vld [vmem:[%s7534_s8 + $0x178] sm:$0xff]   ;;  %v5915_v54 = vld [vmem:[%s7534_s8 + $0x1c0] sm:$0xff]   ;;  %v5917_v56 = vld [vmem:[%s7534_s8 + $0x1c8] sm:$0xff]  }
  0x24   : > { %5190 = vmatpush3.bf16.msra.mxu0 %v5874_v9  ;;  %2354 = vadd.xlane.f32.xlu0 %v2353_v32  ;;  %v5918_v57 = vld [vmem:[%s7534_s8 + $0x190] sm:$0xff]   ;;  %v5920_v59 = vld [vmem:[%s7534_s8 + $0x198] sm:$0xff]   ;;  %v5922_v61 = vld [vmem:[%s7534_s8 + $0x1a0] sm:$0xff]  }
  0x25   : > { %5210 = vmatpush3.bf16.msra.mxu1 %v5875_v10  ;;  %5191 = vmatprep.subr.bf16.mxu0 %v6173_v1  ;;  %v5919_v58 = vld [vmem:[%s7534_s8 + $0x1d0] sm:$0xff]   ;;  %v5921_v60 = vld [vmem:[%s7534_s8 + $0x1d8] sm:$0xff]   ;;  %v5923_v62 = vld [vmem:[%s7534_s8 + $0x1e0] sm:$0xff]  }
  0x26   : > { %5211 = vmatprep.subr.bf16.mxu1 %v6173_v1  ;;  %v5924_v63 = vld [vmem:[%s7534_s8 + $0x1a8] sm:$0xff]   ;;  %v5926_v2 = vld [vmem:[%s7534_s8 + $0x1b0] sm:$0xff]   ;;  %v5928_v4 = vld [vmem:[%s7534_s8 + $0x1b8] sm:$0xff]  }
  0x27   : > { %v5925_v0 = vld [vmem:[%s7534_s8 + $0x1e8] sm:$0xff]   ;;  %v5927_v3 = vld [vmem:[%s7534_s8 + $0x1f0] sm:$0xff]   ;;  %v5929_v5 = vld [vmem:[%s7534_s8 + $0x1f8] sm:$0xff]  }
  0x28   : > { %5192 = vmatpush3.bf16.msra.mxu0 %v5876_v11  ;;  %v5930_v6 = vld [vmem:[%s7536_s10] sm:$0xff]   ;;  %v5932_v8 = vld [vmem:[%s7536_s10 + $0x8] sm:$0xff]   ;;  %v5934_v10 = vld [vmem:[%s7536_s10 + $0x10] sm:$0xff]  }
  0x29   : > { %5212 = vmatpush3.bf16.msra.mxu1 %v5877_v12  ;;  %5193 = vmatprep.subr.bf16.mxu0 %v6173_v1  ;;  %v5931_v7 = vld [vmem:[%s7536_s10 + $0x40] sm:$0xff]   ;;  %v5933_v9 = vld [vmem:[%s7536_s10 + $0x48] sm:$0xff]   ;;  %v5935_v11 = vld [vmem:[%s7536_s10 + $0x50] sm:$0xff]  }
  0x2a   : > { %5213 = vmatprep.subr.bf16.mxu1 %v6173_v1  ;;  %v5936_v12 = vld [vmem:[%s7536_s10 + $0x18] sm:$0xff]   ;;  %v5940_v16 = vld [vmem:[%s7536_s10 + $0x28] sm:$0xff]   ;;  %v5954_v31 = vld [vmem:[%s7536_s10 + $0xa0] sm:$0xff]  }
  0x2b   : > { %v5955_v32 = vld [vmem:[%s7536_s10 + $0xe0] sm:$0xff]  }
  0x2c   : > { %5194 = vmatpush3.bf16.msra.mxu0 %v5878_v13  ;;  %v5937_v13 = vld [vmem:[%s7536_s10 + $0x58] sm:$0xff]  }
  0x2d   : > { %5214 = vmatpush3.bf16.msra.mxu1 %v5879_v14  ;;  %5195 = vmatprep.subr.bf16.mxu0 %v6173_v1  ;;  %v5938_v14 = vld [vmem:[%s7536_s10 + $0x20] sm:$0xff]  }
  0x2e   : > { %5215 = vmatprep.subr.bf16.mxu1 %v6173_v1 }
  0x30   : > { %5196 = vmatpush3.bf16.msra.mxu0 %v5880_v15  ;;  %v5939_v15 = vld [vmem:[%s7536_s10 + $0x60] sm:$0xff]  }
  0x31   : > { %5216 = vmatpush3.bf16.msra.mxu1 %v5881_v17  ;;  %5221 = vmatprep.subr.bf16.mxu0 %v6173_v1  ;;  %v5941_v17 = vld [vmem:[%s7536_s10 + $0x68] sm:$0xff]  }
  0x32   : > { %5241 = vmatprep.subr.bf16.mxu1 %v6173_v1 }
  0x33   : > { %5198 = vmatmul.mubr.bf16.vlgmr.msra.gmra.mrb[0].mxu0 %v6384_v18 }
  0x34   : > { %5218 = vmatmul.mubr.bf16.vlgmr.msra.gmra.mrb[0].mxu1 %v6384_v18  ;;  %5222 = vmatpush3.bf16.msra.mxu0 %v5882_v19  ;;  %v5942_v19 = vld [vmem:[%s7536_s10 + $0x30] sm:$0xff]  }
  0x35   : > { %5242 = vmatpush3.bf16.msra.mxu1 %v5883_v20  ;;  %5223 = vmatprep.subr.bf16.mxu0 %v6173_v1  ;;  %v5943_v20 = vld [vmem:[%s7536_s10 + $0x70] sm:$0xff]  }
  0x36   : > { %5243 = vmatprep.subr.bf16.mxu1 %v6173_v1  ;;  %5237 = vmatprep.mubr.msk.bf16.mxu0 %vm6174_vm0, %v6173_v1 }
  0x37   : > { %5257 = vmatprep.mubr.msk.bf16.mxu1 %vm6174_vm0, %v6173_v1 }
  0x38   : > { %5224 = vmatpush3.bf16.msra.mxu0 %v5884_v21  ;;  %v5944_v21 = vld [vmem:[%s7536_s10 + $0x38] sm:$0xff]  }
  0x39   : > { %5244 = vmatpush3.bf16.msra.mxu1 %v5885_v22  ;;  %5225 = vmatprep.subr.bf16.mxu0 %v6173_v1  ;;  %v5945_v22 = vld [vmem:[%s7536_s10 + $0x78] sm:$0xff]  }
  0x3a   : > { %5245 = vmatprep.subr.bf16.mxu1 %v6173_v1 }
  0x3c   : > { %5226 = vmatpush3.bf16.msra.mxu0 %v5886_v23  ;;  %v5946_v23 = vld [vmem:[%s7536_s10 + $0x80] sm:$0xff]  }
  0x3d   : > { %5246 = vmatpush3.bf16.msra.mxu1 %v5887_v24  ;;  %5227 = vmatprep.subr.bf16.mxu0 %v6173_v1  ;;  %v5947_v24 = vld [vmem:[%s7536_s10 + $0xc0] sm:$0xff]  }
  0x3e   : > { %5247 = vmatprep.subr.bf16.mxu1 %v6173_v1 }
  0x40   : > { %5228 = vmatpush3.bf16.msra.mxu0 %v5888_v25  ;;  %v5948_v25 = vld [vmem:[%s7536_s10 + $0x88] sm:$0xff]  }
  0x41   : > { %5248 = vmatpush3.bf16.msra.mxu1 %v5889_v26  ;;  %5229 = vmatprep.subr.bf16.mxu0 %v6173_v1  ;;  %v5949_v26 = vld [vmem:[%s7536_s10 + $0xc8] sm:$0xff]  }
  0x42   : > { %5249 = vmatprep.subr.bf16.mxu1 %v6173_v1 }
  0x44   : > { %5230 = vmatpush3.bf16.msra.mxu0 %v5890_v27  ;;  %v5950_v27 = vld [vmem:[%s7536_s10 + $0x90] sm:$0xff]  }
  0x45   : > { %5250 = vmatpush3.bf16.msra.mxu1 %v5891_v28  ;;  %5231 = vmatprep.subr.bf16.mxu0 %v6173_v1  ;;  %v5951_v28 = vld [vmem:[%s7536_s10 + $0xd0] sm:$0xff]  }
  0x46   : > { %5251 = vmatprep.subr.bf16.mxu1 %v6173_v1 }
  0x48   : > { %5232 = vmatpush3.bf16.msra.mxu0 %v5892_v29  ;;  %v5952_v29 = vld [vmem:[%s7536_s10 + $0x98] sm:$0xff]  }
  0x49   : > { %5252 = vmatpush3.bf16.msra.mxu1 %v5893_v30  ;;  %5233 = vmatprep.subr.bf16.mxu0 %v6173_v1  ;;  %v5953_v30 = vld [vmem:[%s7536_s10 + $0xd8] sm:$0xff]  }
  0x4a   : > { %5253 = vmatprep.subr.bf16.mxu1 %v6173_v1 }
  0x4c   : > { %5234 = vmatpush3.bf16.msra.mxu0 %v5894_v33  ;;  %v5956_v33 = vld [vmem:[%s7536_s10 + $0xa8] sm:$0xff]  }
  0x4d   : > { %5254 = vmatpush3.bf16.msra.mxu1 %v5895_v34  ;;  %5235 = vmatprep.subr.bf16.mxu0 %v6173_v1  ;;  %v5957_v34 = vld [vmem:[%s7536_s10 + $0xe8] sm:$0xff]  }
  0x4e   : > { %5255 = vmatprep.subr.bf16.mxu1 %v6173_v1 }
  0x50   : > { %5236 = vmatpush3.bf16.msra.mxu0 %v5896_v35  ;;  %v5958_v35 = vld [vmem:[%s7536_s10 + $0xb0] sm:$0xff]  }
  0x51   : > { %5256 = vmatpush3.bf16.msra.mxu1 %v5897_v36  ;;  %5261 = vmatprep.subr.bf16.mxu0 %v6173_v1  ;;  %v5959_v36 = vld [vmem:[%s7536_s10 + $0xf0] sm:$0xff]  }
  0x52   : > { %5281 = vmatprep.subr.bf16.mxu1 %v6173_v1 }
  0x53   : > { %5238 = vmatmul.mubr.bf16.vlgmr.msra.gmra.mrb[4].mxu0 %v6384_v18 }
  0x54   : > { %5258 = vmatmul.mubr.bf16.vlgmr.msra.gmra.mrb[4].mxu1 %v6384_v18  ;;  %5262 = vmatpush3.bf16.msra.mxu0 %v5898_v37  ;;  %v5960_v37 = vld [vmem:[%s7536_s10 + $0xb8] sm:$0xff]  }
  0x55   : > { %5282 = vmatpush3.bf16.msra.mxu1 %v5899_v38  ;;  %5263 = vmatprep.subr.bf16.mxu0 %v6173_v1  ;;  %v5961_v38 = vld [vmem:[%s7536_s10 + $0xf8] sm:$0xff]  }
  0x56   : > { %5283 = vmatprep.subr.bf16.mxu1 %v6173_v1  ;;  %5277 = vmatprep.mubr.msk.bf16.mxu0 %vm6174_vm0, %v6173_v1 }
  0x57   : > { %5297 = vmatprep.mubr.msk.bf16.mxu1 %vm6174_vm0, %v6173_v1 }
  0x58   : > { %5264 = vmatpush3.bf16.msra.mxu0 %v5900_v39  ;;  %v5962_v39 = vld [vmem:[%s7536_s10 + $0x100] sm:$0xff]  }
  0x59   : > { %5284 = vmatpush3.bf16.msra.mxu1 %v5901_v40  ;;  %5265 = vmatprep.subr.bf16.mxu0 %v6173_v1  ;;  %v5963_v40 = vld [vmem:[%s7536_s10 + $0x140] sm:$0xff]  }
  0x5a   : > { %5285 = vmatprep.subr.bf16.mxu1 %v6173_v1 }
  0x5c   : > { %5266 = vmatpush3.bf16.msra.mxu0 %v5902_v41  ;;  %v5964_v41 = vld [vmem:[%s7536_s10 + $0x108] sm:$0xff]  }
  0x5d   : > { %5286 = vmatpush3.bf16.msra.mxu1 %v5903_v42  ;;  %5267 = vmatprep.subr.bf16.mxu0 %v6173_v1  ;;  %v5965_v42 = vld [vmem:[%s7536_s10 + $0x148] sm:$0xff]  }
  0x5e   : > { %5287 = vmatprep.subr.bf16.mxu1 %v6173_v1 }
  0x60   : > { %5268 = vmatpush3.bf16.msra.mxu0 %v5904_v43  ;;  %v5966_v43 = vld [vmem:[%s7536_s10 + $0x110] sm:$0xff]  }
  0x61   : > { %5288 = vmatpush3.bf16.msra.mxu1 %v5905_v44  ;;  %5269 = vmatprep.subr.bf16.mxu0 %v6173_v1  ;;  %v5967_v44 = vld [vmem:[%s7536_s10 + $0x150] sm:$0xff]  }
  0x62   : > { %5289 = vmatprep.subr.bf16.mxu1 %v6173_v1 }
  0x64   : > { %5270 = vmatpush3.bf16.msra.mxu0 %v5906_v45  ;;  %v5968_v45 = vld [vmem:[%s7536_s10 + $0x118] sm:$0xff]  }
  0x65   : > { %5290 = vmatpush3.bf16.msra.mxu1 %v5907_v46  ;;  %5271 = vmatprep.subr.bf16.mxu0 %v6173_v1  ;;  %v5969_v46 = vld [vmem:[%s7536_s10 + $0x158] sm:$0xff]  }
  0x66   : > { %5291 = vmatprep.subr.bf16.mxu1 %v6173_v1 }
  0x68   : > { %5272 = vmatpush3.bf16.msra.mxu0 %v5908_v47  ;;  %v5970_v47 = vld [vmem:[%s7536_s10 + $0x120] sm:$0xff]  }
  0x69   : > { %5292 = vmatpush3.bf16.msra.mxu1 %v5909_v48  ;;  %5273 = vmatprep.subr.bf16.mxu0 %v6173_v1  ;;  %v5971_v48 = vld [vmem:[%s7536_s10 + $0x160] sm:$0xff]  }
  0x6a   : > { %5293 = vmatprep.subr.bf16.mxu1 %v6173_v1 }
  0x6c   : > { %5274 = vmatpush3.bf16.msra.mxu0 %v5910_v49  ;;  %v5972_v49 = vld [vmem:[%s7536_s10 + $0x128] sm:$0xff]  }
  0x6d   : > { %5294 = vmatpush3.bf16.msra.mxu1 %v5911_v50  ;;  %5275 = vmatprep.subr.bf16.mxu0 %v6173_v1  ;;  %v5973_v50 = vld [vmem:[%s7536_s10 + $0x168] sm:$0xff]  }
  0x6e   : > { %5295 = vmatprep.subr.bf16.mxu1 %v6173_v1 }
  0x70   : > { %5276 = vmatpush3.bf16.msra.mxu0 %v5912_v51  ;;  %v5974_v51 = vld [vmem:[%s7536_s10 + $0x130] sm:$0xff]  }
  0x71   : > { %5296 = vmatpush3.bf16.msra.mxu1 %v5913_v52  ;;  %5301 = vmatprep.subr.bf16.mxu0 %v6173_v1  ;;  %v5975_v52 = vld [vmem:[%s7536_s10 + $0x170] sm:$0xff]  }
  0x72   : > { %5321 = vmatprep.subr.bf16.mxu1 %v6173_v1 }
  0x73   : > { %5278 = vmatmul.mubr.bf16.vlgmr.msra.gmra.mrb[8].mxu0 %v6384_v18 }
  0x74   : > { %5298 = vmatmul.mubr.bf16.vlgmr.msra.gmra.mrb[8].mxu1 %v6384_v18  ;;  %5302 = vmatpush3.bf16.msra.mxu0 %v5914_v53  ;;  %v5976_v53 = vld [vmem:[%s7536_s10 + $0x138] sm:$0xff]  }
  0x75   : > { %5322 = vmatpush3.bf16.msra.mxu1 %v5915_v54  ;;  %5303 = vmatprep.subr.bf16.mxu0 %v6173_v1  ;;  %v5977_v54 = vld [vmem:[%s7536_s10 + $0x178] sm:$0xff]  }
  0x76   : > { %5323 = vmatprep.subr.bf16.mxu1 %v6173_v1  ;;  %5317 = vmatprep.mubr.msk.bf16.mxu0 %vm6174_vm0, %v6173_v1 }
  0x77   : > { %5337 = vmatprep.mubr.msk.bf16.mxu1 %vm6174_vm0, %v6173_v1 }
  0x78   : > { %5304 = vmatpush3.bf16.msra.mxu0 %v5916_v55  ;;  %v5978_v55 = vld [vmem:[%s7536_s10 + $0x180] sm:$0xff]  }
  0x79   : > { %5324 = vmatpush3.bf16.msra.mxu1 %v5917_v56  ;;  %5305 = vmatprep.subr.bf16.mxu0 %v6173_v1  ;;  %v5979_v56 = vld [vmem:[%s7536_s10 + $0x1c0] sm:$0xff]  }
  0x7a   : > { %5325 = vmatprep.subr.bf16.mxu1 %v6173_v1 }
  0x7c   : > { %5306 = vmatpush3.bf16.msra.mxu0 %v5918_v57  ;;  %v5980_v57 = vld [vmem:[%s7536_s10 + $0x188] sm:$0xff]  }
  0x7d   : > { %5326 = vmatpush3.bf16.msra.mxu1 %v5919_v58  ;;  %5307 = vmatprep.subr.bf16.mxu0 %v6173_v1  ;;  %v5981_v58 = vld [vmem:[%s7536_s10 + $0x1c8] sm:$0xff]  }
  0x7e   : > { %5327 = vmatprep.subr.bf16.mxu1 %v6173_v1 }
  0x80   : > { %5308 = vmatpush3.bf16.msra.mxu0 %v5920_v59  ;;  %v5982_v59 = vld [vmem:[%s7536_s10 + $0x190] sm:$0xff]  }
  0x81   : > { %5328 = vmatpush3.bf16.msra.mxu1 %v5921_v60  ;;  %5309 = vmatprep.subr.bf16.mxu0 %v6173_v1  ;;  %v5983_v60 = vld [vmem:[%s7536_s10 + $0x1d0] sm:$0xff]  }
  0x82   : > { %5329 = vmatprep.subr.bf16.mxu1 %v6173_v1 }
  0x84   : > { %5310 = vmatpush3.bf16.msra.mxu0 %v5922_v61  ;;  %v5984_v61 = vld [vmem:[%s7536_s10 + $0x198] sm:$0xff]  }
  0x85   : > { %5330 = vmatpush3.bf16.msra.mxu1 %v5923_v62  ;;  %5311 = vmatprep.subr.bf16.mxu0 %v6173_v1  ;;  %v5985_v62 = vld [vmem:[%s7536_s10 + $0x1d8] sm:$0xff]  }
  0x86   : > { %5331 = vmatprep.subr.bf16.mxu1 %v6173_v1 }
  0x88   : > { %5312 = vmatpush3.bf16.msra.mxu0 %v5924_v63  ;;  %v5986_v63 = vld [vmem:[%s7536_s10 + $0x1a0] sm:$0xff]  }
  0x89   : > { %5332 = vmatpush3.bf16.msra.mxu1 %v5925_v0  ;;  %5313 = vmatprep.subr.bf16.mxu0 %v6173_v1 }
  0x8a   : > { %5333 = vmatprep.subr.bf16.mxu1 %v6173_v1 }
  0x8c   : > { %5314 = vmatpush3.bf16.msra.mxu0 %v5926_v2  ;;  %v5987_v2 = vld [vmem:[%s7536_s10 + $0x1e0] sm:$0xff]  }
  0x8d   : > { %5334 = vmatpush3.bf16.msra.mxu1 %v5927_v3  ;;  %5315 = vmatprep.subr.bf16.mxu0 %v6173_v1  ;;  %v4668_v3 = vld [vmem:[%s7535_s9] ss:$0 sm:$0xff] }
  0x8e   : > { %5335 = vmatprep.subr.bf16.mxu1 %v6173_v1 }
  0x90   : > { %5316 = vmatpush3.bf16.msra.mxu0 %v5928_v4  ;;  %v5988_v4 = vld [vmem:[%s7536_s10 + $0x1a8] sm:$0xff]  }
  0x91   : > { %5336 = vmatpush3.bf16.msra.mxu1 %v5929_v5  ;;  %5341 = vmatprep.subr.bf16.mxu0 %v6173_v1  ;;  %v4669_v5 = vld [vmem:[%s7535_s9 + $0x1] ss:$0 sm:$0xff] }
  0x92   : > { %5361 = vmatprep.subr.bf16.mxu1 %v6173_v1 }
  0x93   : > { %5318 = vmatmul.mubr.bf16.vlgmr.msra.gmra.mrb[12].mxu0 %v6384_v18 }
  0x94   : > { %5338 = vmatmul.mubr.bf16.vlgmr.msra.gmra.mrb[12].mxu1 %v6384_v18  ;;  %5342 = vmatpush3.bf16.msra.mxu0 %v5930_v6  ;;  %v5989_v6 = vld [vmem:[%s7536_s10 + $0x1e8] sm:$0xff]  }
  0x95   : > { %5362 = vmatpush3.bf16.msra.mxu1 %v5931_v7  ;;  %5343 = vmatprep.subr.bf16.mxu0 %v6173_v1 }
  0x96   : > { %5363 = vmatprep.subr.bf16.mxu1 %v6173_v1  ;;  %5357 = vmatprep.mubr.msk.bf16.mxu0 %vm6174_vm0, %v6173_v1 }
  0x97   : > { %5377 = vmatprep.mubr.msk.bf16.mxu1 %vm6174_vm0, %v6173_v1 }
  0x98   : > { %5344 = vmatpush3.bf16.msra.mxu0 %v5932_v8 }
  0x99   : > { %5364 = vmatpush3.bf16.msra.mxu1 %v5933_v9  ;;  %5345 = vmatprep.subr.bf16.mxu0 %v6173_v1 }
  0x9a   : > { %5365 = vmatprep.subr.bf16.mxu1 %v6173_v1 }
  0x9c   : > { %5346 = vmatpush3.bf16.msra.mxu0 %v5934_v10 }
  0x9d   : > { %5366 = vmatpush3.bf16.msra.mxu1 %v5935_v11  ;;  %5347 = vmatprep.subr.bf16.mxu0 %v6173_v1 }
  0x9e   : > { %5367 = vmatprep.subr.bf16.mxu1 %v6173_v1 }
  0xa0   : > { %5348 = vmatpush3.bf16.msra.mxu0 %v5936_v12 }
  0xa1   : > { %5368 = vmatpush3.bf16.msra.mxu1 %v5937_v13  ;;  %5349 = vmatprep.subr.bf16.mxu0 %v6173_v1 }
  0xa2   : > { %5369 = vmatprep.subr.bf16.mxu1 %v6173_v1 }
  0xa4   : > { %5350 = vmatpush3.bf16.msra.mxu0 %v5938_v14 }
  0xa5   : > { %5370 = vmatpush3.bf16.msra.mxu1 %v5939_v15  ;;  %5351 = vmatprep.subr.bf16.mxu0 %v6173_v1 }
  0xa6   : > { %5371 = vmatprep.subr.bf16.mxu1 %v6173_v1 }
  0xa8   : > { %5352 = vmatpush3.bf16.msra.mxu0 %v5940_v16  ;;  %v5990_v16 = vld [vmem:[%s7536_s10 + $0x1b0] sm:$0xff]  }
  0xa9   : > { %5372 = vmatpush3.bf16.msra.mxu1 %v5941_v17  ;;  %5353 = vmatprep.subr.bf16.mxu0 %v6173_v1 }
  0xaa   : > { %5373 = vmatprep.subr.bf16.mxu1 %v6173_v1 }
  0xac   : > { %5354 = vmatpush3.bf16.msra.mxu0 %v5942_v19 }
  0xad   : > { %5374 = vmatpush3.bf16.msra.mxu1 %v5943_v20  ;;  %5355 = vmatprep.subr.bf16.mxu0 %v6173_v1  ;;  %v2351_v0 = vpop.xlane.xlu0 %2350 }
  0xae   : > { %5375 = vmatprep.subr.bf16.mxu1 %v6173_v1  ;;  %v6873_v12 = vmul.f32 0.03125, %v2351_v0  ;;  %v6008_v0 = vld [vmem:[%s7532_s6 + $0x38] sm:$0xff]  }
  0xb0   : > { %5356 = vmatpush3.bf16.msra.mxu0 %v5944_v21  ;;  %v5991_v21 = vld [vmem:[%s7536_s10 + $0x1f0] sm:$0xff]  }
  0xb1   : > { %5376 = vmatpush3.bf16.msra.mxu1 %v5945_v22  ;;  %5381 = vmatprep.subr.bf16.mxu0 %v6173_v1  ;;  %v2355_v8 = vpop.xlane.xlu0 %2354 }
  0xb2   : > { %5401 = vmatprep.subr.bf16.mxu1 %v6173_v1 }
  0xb3   : > { %5358 = vmatmul.mubr.bf16.vlgmr.msra.gmra.mrb[16].mxu0 %v6384_v18 }
  0xb4   : > { %5378 = vmatmul.mubr.bf16.vlgmr.msra.gmra.mrb[16].mxu1 %v6384_v18  ;;  %5382 = vmatpush3.bf16.msra.mxu0 %v5946_v23 }
  0xb5   : > { %5402 = vmatpush3.bf16.msra.mxu1 %v5947_v24  ;;  %5383 = vmatprep.subr.bf16.mxu0 %v6173_v1  ;;  %v2357_v24 = vmul.f32 %v6873_v12, %v6873_v12 }
  0xb6   : > { %5403 = vmatprep.subr.bf16.mxu1 %v6173_v1  ;;  %5397 = vmatprep.mubr.msk.bf16.mxu0 %vm6174_vm0, %v6173_v1 }
  0xb7   : > { %5417 = vmatprep.mubr.msk.bf16.mxu1 %vm6174_vm0, %v6173_v1 }
  0xb8   : > { %5384 = vmatpush3.bf16.msra.mxu0 %v5948_v25  ;;  %v2356_v25 = vmul.f32 0.03125, %v2355_v8  ;;  %v6013_v8 = vld [vmem:[%s7532_s6 + $0xc8] sm:$0xff]  }
  0xb9   : > { %5404 = vmatpush3.bf16.msra.mxu1 %v5949_v26  ;;  %5385 = vmatprep.subr.bf16.mxu0 %v6173_v1  ;;  %v5992_v26 = vld [vmem:[%s7536_s10 + $0x1b8] sm:$0xff]  }
  0xba   : > { %5405 = vmatprep.subr.bf16.mxu1 %v6173_v1 }
  0xbc   : > { %5386 = vmatpush3.bf16.msra.mxu0 %v5950_v27  ;;  %v5993_v27 = vld [vmem:[%s7536_s10 + $0x1f8] sm:$0xff]  }
  0xbd   : > { %5406 = vmatpush3.bf16.msra.mxu1 %v5951_v28  ;;  %5387 = vmatprep.subr.bf16.mxu0 %v6173_v1  ;;  %v2358_v28 = vsub.f32 %v2356_v25, %v2357_v24 }
  0xbe   : > { %5407 = vmatprep.subr.bf16.mxu1 %v6173_v1 }
  0xc0   : > { %5388 = vmatpush3.bf16.msra.mxu0 %v5952_v29  ;;  %v5994_v29 = vld [vmem:[%s7532_s6] sm:$0xff]  }
  0xc1   : > { %5408 = vmatpush3.bf16.msra.mxu1 %v5953_v30  ;;  %5389 = vmatprep.subr.bf16.mxu0 %v6173_v1  ;;  %v5995_v30 = vld [vmem:[%s7532_s6 + $0x40] sm:$0xff]  }
  0xc2   : > { %5409 = vmatprep.subr.bf16.mxu1 %v6173_v1 }
  0xc4   : > { %5390 = vmatpush3.bf16.msra.mxu0 %v5954_v31  ;;  %v2360_v31 = vadd.f32 1e-05, %v2358_v28 }
  0xc5   : > { %5410 = vmatpush3.bf16.msra.mxu1 %v5955_v32  ;;  %5391 = vmatprep.subr.bf16.mxu0 %v6173_v1  ;;  %v5996_v32 = vld [vmem:[%s7532_s6 + $0x8] sm:$0xff]  }
  0xc6   : > { %5411 = vmatprep.subr.bf16.mxu1 %v6173_v1  ;;  %6058 = vrsqrt.f32 %v2360_v31  ;;  %v6023_v31 = vld [vmem:[%s7532_s6 + $0xf0] sm:$0xff]  }
  0xc8   : > { %5392 = vmatpush3.bf16.msra.mxu0 %v5956_v33  ;;  %v5997_v33 = vld [vmem:[%s7532_s6 + $0x48] sm:$0xff]  }
  0xc9   : > { %5412 = vmatpush3.bf16.msra.mxu1 %v5957_v34  ;;  %5393 = vmatprep.subr.bf16.mxu0 %v6173_v1  ;;  %v5999_v34 = vld [vmem:[%s7532_s6 + $0x50] sm:$0xff]  }
  0xca   : > { %5413 = vmatprep.subr.bf16.mxu1 %v6173_v1 }
  0xcc   : > { %5394 = vmatpush3.bf16.msra.mxu0 %v5958_v35  ;;  %v6000_v35 = vld [vmem:[%s7532_s6 + $0x18] sm:$0xff]  }
  0xcd   : > { %5414 = vmatpush3.bf16.msra.mxu1 %v5959_v36  ;;  %5395 = vmatprep.subr.bf16.mxu0 %v6173_v1  ;;  %v6001_v36 = vld [vmem:[%s7532_s6 + $0x58] sm:$0xff]  }
  0xce   : > { %5415 = vmatprep.subr.bf16.mxu1 %v6173_v1 }
  0xd0   : > { %5396 = vmatpush3.bf16.msra.mxu0 %v5960_v37  ;;  %v6002_v37 = vld [vmem:[%s7532_s6 + $0x20] sm:$0xff]  }
  0xd1   : > { %5416 = vmatpush3.bf16.msra.mxu1 %v5961_v38  ;;  %5421 = vmatprep.subr.bf16.mxu0 %v6173_v1  ;;  %v6092_v38 = vld [vmem:[%s6436_s28] sm:$0xff] }
  0xd2   : > { %5441 = vmatprep.subr.bf16.mxu1 %v6173_v1 }
  0xd3   : > { %5398 = vmatmul.mubr.bf16.vlgmr.msra.gmra.mrb[20].mxu0 %v6384_v18 }
  0xd4   : > { %5418 = vmatmul.mubr.bf16.vlgmr.msra.gmra.mrb[20].mxu1 %v6384_v18  ;;  %5422 = vmatpush3.bf16.msra.mxu0 %v5962_v39  ;;  %v2359_v39 = vsub.f32 %v6092_v38, %v6873_v12  ;;  %v6017_v12 = vld [vmem:[%s7532_s6 + $0xd8] sm:$0xff]   ;;  %v6029_v38 = vld [vmem:[%s7532_s6 + $0x148] sm:$0xff]  }
  0xd5   : > { %5442 = vmatpush3.bf16.msra.mxu1 %v5963_v40  ;;  %5423 = vmatprep.subr.bf16.mxu0 %v6173_v1  ;;  %v6003_v40 = vld [vmem:[%s7532_s6 + $0x60] sm:$0xff]  }
  0xd6   : > { %5443 = vmatprep.subr.bf16.mxu1 %v6173_v1  ;;  %5437 = vmatprep.mubr.msk.bf16.mxu0 %vm6174_vm0, %v6173_v1 }
  0xd7   : > { %5457 = vmatprep.mubr.msk.bf16.mxu1 %vm6174_vm0, %v6173_v1 }
  0xd8   : > { %5424 = vmatpush3.bf16.msra.mxu0 %v5964_v41  ;;  %v6059_v41 = vpop.eup %6058 }
  0xd9   : > { %5444 = vmatpush3.bf16.msra.mxu1 %v5965_v42  ;;  %5425 = vmatprep.subr.bf16.mxu0 %v6173_v1  ;;  %v4670_v42 = vld [vmem:[%s7535_s9 + $0x2] ss:$0 sm:$0xff] }
  0xda   : > { %5445 = vmatprep.subr.bf16.mxu1 %v6173_v1 }
  0xdc   : > { %5426 = vmatpush3.bf16.msra.mxu0 %v5966_v43  ;;  %v6004_v43 = vld [vmem:[%s7532_s6 + $0x28] sm:$0xff]  }
  0xdd   : > { %5446 = vmatpush3.bf16.msra.mxu1 %v5967_v44  ;;  %5427 = vmatprep.subr.bf16.mxu0 %v6173_v1  ;;  %v2362_v44 = vmul.f32 %v6059_v41, %v2359_v39  ;;  %v6030_v39 = vld [vmem:[%s7532_s6 + $0x110] sm:$0xff]   ;;  %v6032_v41 = vld [vmem:[%s7532_s6 + $0x118] sm:$0xff]  }
  0xde   : > { %5447 = vmatprep.subr.bf16.mxu1 %v6173_v1 }
  0xe0   : > { %5428 = vmatpush3.bf16.msra.mxu0 %v5968_v45  ;;  %v4671_v45 = vld [vmem:[%s7535_s9 + $0x3] ss:$0 sm:$0xff] }
  0xe1   : > { %5448 = vmatpush3.bf16.msra.mxu1 %v5969_v46  ;;  %5429 = vmatprep.subr.bf16.mxu0 %v6173_v1  ;;  %v6005_v46 = vld [vmem:[%s7532_s6 + $0x68] sm:$0xff]  }
  0xe2   : > { %5449 = vmatprep.subr.bf16.mxu1 %v6173_v1 }
  0xe4   : > { %5430 = vmatpush3.bf16.msra.mxu0 %v5970_v47  ;;  %v4812_v47 = vld [vmem:[%s7530_s4] ss:$0 sm:$0xff] }
  0xe5   : > { %5450 = vmatpush3.bf16.msra.mxu1 %v5971_v48  ;;  %5431 = vmatprep.subr.bf16.mxu0 %v6173_v1 }
  0xe6   : > { %5451 = vmatprep.subr.bf16.mxu1 %v6173_v1 }
  0xe8   : > { %5432 = vmatpush3.bf16.msra.mxu0 %v5972_v49 }
  0xe9   : > { %5452 = vmatpush3.bf16.msra.mxu1 %v5973_v50  ;;  %5433 = vmatprep.subr.bf16.mxu0 %v6173_v1 }
  0xea   : > { %5453 = vmatprep.subr.bf16.mxu1 %v6173_v1 }
  0xec   : > { %5434 = vmatpush3.bf16.msra.mxu0 %v5974_v51 }
  0xed   : > { %5454 = vmatpush3.bf16.msra.mxu1 %v5975_v52  ;;  %5435 = vmatprep.subr.bf16.mxu0 %v6173_v1 }
  0xee   : > { %5455 = vmatprep.subr.bf16.mxu1 %v6173_v1 }
  0xf0   : > { %5436 = vmatpush3.bf16.msra.mxu0 %v5976_v53 }
  0xf1   : > { %5456 = vmatpush3.bf16.msra.mxu1 %v5977_v54  ;;  %5461 = vmatprep.subr.bf16.mxu0 %v6173_v1 }
  0xf2   : > { %5481 = vmatprep.subr.bf16.mxu1 %v6173_v1 }
  0xf3   : > { %5438 = vmatmul.mubr.bf16.vlgmr.msra.gmra.mrb[24].mxu0 %v6384_v18 }
  0xf4   : > { %5458 = vmatmul.mubr.bf16.vlgmr.msra.gmra.mrb[24].mxu1 %v6384_v18  ;;  %5462 = vmatpush3.bf16.msra.mxu0 %v5978_v55  ;;  %v6006_v55 = vld [vmem:[%s7532_s6 + $0x30] sm:$0xff]  }
  0xf5   : > { %5482 = vmatpush3.bf16.msra.mxu1 %v5979_v56  ;;  %5463 = vmatprep.subr.bf16.mxu0 %v6173_v1  ;;  %v2370_v56 = vmul.f32 %v4812_v47, %v2362_v44  ;;  %v6035_v44 = vld [vmem:[%s7532_s6 + $0x160] sm:$0xff]  }
  0xf6   : > { %5483 = vmatprep.subr.bf16.mxu1 %v6173_v1  ;;  %5477 = vmatprep.mubr.msk.bf16.mxu0 %vm6174_vm0, %v6173_v1  ;;  %v4675_v47 = vld [vmem:[%s7535_s9 + $0x7] ss:$0 sm:$0xff] }
  0xf7   : > { %5497 = vmatprep.mubr.msk.bf16.mxu1 %vm6174_vm0, %v6173_v1 }
  0xf8   : > { %5464 = vmatpush3.bf16.msra.mxu0 %v5980_v57 }
  0xf9   : > { %5484 = vmatpush3.bf16.msra.mxu1 %v5981_v58  ;;  %5465 = vmatprep.subr.bf16.mxu0 %v6173_v1 }
  0xfa   : > { %5485 = vmatprep.subr.bf16.mxu1 %v6173_v1 }
  0xfc   : > { %5466 = vmatpush3.bf16.msra.mxu0 %v5982_v59 }
  0xfd   : > { %5486 = vmatpush3.bf16.msra.mxu1 %v5983_v60  ;;  %5467 = vmatprep.subr.bf16.mxu0 %v6173_v1  ;;  %v6007_v60 = vld [vmem:[%s7532_s6 + $0x70] sm:$0xff]  }
  0xfe   : > { %5487 = vmatprep.subr.bf16.mxu1 %v6173_v1 }
 0x100   : > { %5468 = vmatpush3.bf16.msra.mxu0 %v5984_v61  ;;  %v4813_v61 = vld [vmem:[%s7531_s5] ss:$0 sm:$0xff] }
 0x101   : > { %5488 = vmatpush3.bf16.msra.mxu1 %v5985_v62  ;;  %5469 = vmatprep.subr.bf16.mxu0 %v6173_v1 }
 0x102   : > { %5489 = vmatprep.subr.bf16.mxu1 %v6173_v1 }
 0x104   : > { %5470 = vmatpush3.bf16.msra.mxu0 %v5986_v63 }
 0x105   : > { %5490 = vmatpush3.bf16.msra.mxu1 %v5987_v2  ;;  %5471 = vmatprep.subr.bf16.mxu0 %v6173_v1  ;;  %v2378_v2 = vadd.f32 %v4813_v61, %v2370_v56  ;;  %v6038_v56 = vld [vmem:[%s7532_s6 + $0x130] sm:$0xff]  }
 0x106   : > { %v806_v7 = vpop.f32.mrb[0].mxu0  ;;  %5491 = vmatprep.subr.bf16.mxu1 %v6173_v1 }
 0x107   : > { %v807_v9 = vadd.f32 %v4668_v3, %v806_v7  ;;  %v5199_v10 = vpop.f32.mrb[1].mxu0  ;;  %v894_v11 = vpop.f32.mrb[0].mxu1  ;;  %v6009_v3 = vld [vmem:[%s7532_s6 + $0x78] sm:$0xff]   ;;  %v6012_v7 = vld [vmem:[%s7532_s6 + $0x88] sm:$0xff]  }
 0x108   : > { %v809_v13 = vpop.f32.mrb[2].mxu0  ;;  %v895_v14 = vadd.f32 %v4669_v5, %v894_v11  ;;  %5472 = vmatpush3.bf16.msra.mxu0 %v5988_v4  ;;  %v5219_v15 = vpop.f32.mrb[1].mxu1  ;;  %v6010_v4 = vld [vmem:[%s7532_s6 + $0x80] sm:$0xff]   ;;  %v6984_v5 = vpack.c.bf16 %v2378_v2, %v2378_v2  ;;  %v6015_v10 = vld [vmem:[%s7532_s6 + $0xd0] sm:$0xff]   ;;  %v6016_v11 = vld [vmem:[%s7532_s6 + $0x98] sm:$0xff]  }
 0x109   : > { %v2316_v17 = vpack.c.bf16 %v807_v9, %v807_v9  ;;  %5492 = vmatpush3.bf16.msra.mxu1 %v5989_v6  ;;  %v5200_v19 = vpop.f32.mrb[3].mxu0  ;;  %v897_v20 = vpop.f32.mrb[2].mxu1  ;;  %5473 = vmatprep.subr.bf16.mxu0 %v6173_v1  ;;  %v6011_v6 = vld [vmem:[%s7532_s6 + $0xc0] sm:$0xff]   ;;  %v6014_v9 = vld [vmem:[%s7532_s6 + $0x90] sm:$0xff]  }
 0x10a   : > { %v2317_v22 = vpack.c.bf16 %v895_v14, %v895_v14  ;;  %v5220_v23 = vpop.f32.mrb[3].mxu1  ;;  %5493 = vmatprep.subr.bf16.mxu1 %v6173_v1  ;;  %v6018_v13 = vld [vmem:[%s7532_s6 + $0xa0] sm:$0xff]   ;;  %v6021_v19 = vld [vmem:[%s7532_s6 + $0xe8] sm:$0xff]  }
 0x10b   : > { %2325 = vst.msk [vmem:[#allocation2] sm:$0xf] %vm2324_vm1, %v2316_v17  ;;  %v6019_v14 = vld [vmem:[%s7532_s6 + $0xe0] sm:$0xff]  }
 0x10c   : > { %2326 = vst.msk [vmem:[#allocation2 + $0x4] sm:$0xf] %vm2324_vm1, %v2317_v22  ;;  %5474 = vmatpush3.bf16.msra.mxu0 %v5990_v16  ;;  %v4672_v15 = vld [vmem:[%s7535_s9 + $0x4] ss:$0 sm:$0xff]  ;;  %v6020_v16 = vld [vmem:[%s7532_s6 + $0xa8] sm:$0xff]  }
 0x10d   : > { %5494 = vmatpush3.bf16.msra.mxu1 %v5991_v21  ;;  %5475 = vmatprep.subr.bf16.mxu0 %v6173_v1  ;;  %v4673_v17 = vld [vmem:[%s7535_s9 + $0x5] ss:$0 sm:$0xff] }
 0x10e   : > { %5495 = vmatprep.subr.bf16.mxu1 %v6173_v1  ;;  %v6042_v2 = vld [vmem:[%s7532_s6 + $0x180] sm:$0xff]  }
 0x110   : > { %5476 = vmatpush3.bf16.msra.mxu0 %v5992_v26 }
 0x111   : > { %5496 = vmatpush3.bf16.msra.mxu1 %v5993_v27  ;;  %5501 = vmatprep.subr.bf16.mxu0 %v6173_v1  ;;  %v6022_v27 = vld [vmem:[%s7532_s6 + $0xb0] sm:$0xff]  }
 0x112   : > { %5521 = vmatprep.subr.bf16.mxu1 %v6173_v1 }
 0x113   : > { %5478 = vmatmul.mubr.bf16.vlgmr.msra.gmra.mrb[28].mxu0 %v6384_v18 }
 0x114   : > { %5498 = vmatmul.mubr.bf16.vlgmr.msra.gmra.mrb[28].mxu1 %v6384_v18  ;;  %5502 = vmatpush3.bf16.msra.mxu0 %v5994_v29  ;;  %v5998_v18 = vld [vmem:[%s7532_s6 + $0x10] sm:$0xff]  }
 0x115   : > { %5522 = vmatpush3.bf16.msra.mxu1 %v5995_v30  ;;  %5503 = vmatprep.subr.bf16.mxu0 %v6173_v1 }
 0x116   : > { %5523 = vmatprep.subr.bf16.mxu1 %v6173_v1  ;;  %5517 = vmatprep.mubr.msk.bf16.mxu0 %vm6174_vm0, %v6173_v1 }
 0x117   : > { %5537 = vmatprep.mubr.msk.bf16.mxu1 %vm6174_vm0, %v6173_v1 }
 0x118   : > { %5504 = vmatpush3.bf16.msra.mxu0 %v5996_v32 }
 0x119   : > { %5524 = vmatpush3.bf16.msra.mxu1 %v5997_v33  ;;  %5505 = vmatprep.subr.bf16.mxu0 %v6173_v1 }
 0x11a   : > { %5525 = vmatprep.subr.bf16.mxu1 %v6173_v1 }
 0x11c   : > { %5506 = vmatpush3.bf16.msra.mxu0 %v5998_v18  ;;  %v6024_v18 = vld [vmem:[%s7532_s6 + $0xb8] sm:$0xff]  }
 0x11d   : > { %5526 = vmatpush3.bf16.msra.mxu1 %v5999_v34  ;;  %5507 = vmatprep.subr.bf16.mxu0 %v6173_v1  ;;  %v6025_v34 = vld [vmem:[%s7532_s6 + $0xf8] sm:$0xff]  }
 0x11e   : > { %5527 = vmatprep.subr.bf16.mxu1 %v6173_v1 }
 0x120   : > { %5508 = vmatpush3.bf16.msra.mxu0 %v6000_v35  ;;  %v6026_v35 = vld [vmem:[%s7532_s6 + $0x100] sm:$0xff]  }
 0x121   : > { %5528 = vmatpush3.bf16.msra.mxu1 %v6001_v36  ;;  %5509 = vmatprep.subr.bf16.mxu0 %v6173_v1  ;;  %v6027_v36 = vld [vmem:[%s7532_s6 + $0x140] sm:$0xff]  }
 0x122   : > { %5529 = vmatprep.subr.bf16.mxu1 %v6173_v1 }
 0x124   : > { %5510 = vmatpush3.bf16.msra.mxu0 %v6002_v37  ;;  %v6028_v37 = vld [vmem:[%s7532_s6 + $0x108] sm:$0xff]  }
 0x125   : > { %5530 = vmatpush3.bf16.msra.mxu1 %v6003_v40  ;;  %5511 = vmatprep.subr.bf16.mxu0 %v6173_v1  ;;  %v6031_v40 = vld [vmem:[%s7532_s6 + $0x150] sm:$0xff]  }
 0x126   : > { %v982_v48 = vpop.f32.mrb[4].mxu0  ;;  %5531 = vmatprep.subr.bf16.mxu1 %v6173_v1 }
 0x127   : > { %v983_v49 = vadd.f32 %v4670_v42, %v982_v48  ;;  %v5239_v50 = vpop.f32.mrb[5].mxu0  ;;  %v1070_v51 = vpop.f32.mrb[4].mxu1  ;;  %v6033_v42 = vld [vmem:[%s7532_s6 + $0x158] sm:$0xff]   ;;  %v6037_v48 = vld [vmem:[%s7532_s6 + $0x168] sm:$0xff]  }
 0x128   : > { %v985_v52 = vpop.f32.mrb[6].mxu0  ;;  %v1071_v53 = vadd.f32 %v4671_v45, %v1070_v51  ;;  %5512 = vmatpush3.bf16.msra.mxu0 %v6004_v43  ;;  %v5259_v54 = vpop.f32.mrb[5].mxu1  ;;  %v6034_v43 = vld [vmem:[%s7532_s6 + $0x120] sm:$0xff]  }
 0x129   : > { %v2318_v57 = vpack.c.bf16 %v983_v49, %v983_v49  ;;  %5532 = vmatpush3.bf16.msra.mxu1 %v6005_v46  ;;  %v5240_v58 = vpop.f32.mrb[7].mxu0  ;;  %v1073_v59 = vpop.f32.mrb[6].mxu1  ;;  %5513 = vmatprep.subr.bf16.mxu0 %v6173_v1  ;;  %v4674_v45 = vld [vmem:[%s7535_s9 + $0x6] ss:$0 sm:$0xff]  ;;  %v6036_v46 = vld [vmem:[%s7532_s6 + $0x128] sm:$0xff]  }
 0x12a   : > { %v2319_v62 = vpack.c.bf16 %v1071_v53, %v1071_v53  ;;  %v5260_v63 = vpop.f32.mrb[7].mxu1  ;;  %5533 = vmatprep.subr.bf16.mxu1 %v6173_v1 }
 0x12b   : > { %2327 = vst.msk [vmem:[#allocation2 + $0x8] sm:$0xf] %vm2324_vm1, %v2318_v57  ;;  %v6040_v63 = vld [vmem:[%s7532_s6 + $0x138] sm:$0xff]  }
 0x12c   : > { %2328 = vst.msk [vmem:[#allocation2 + $0xc] sm:$0xf] %vm2324_vm1, %v2319_v62  ;;  %5514 = vmatpush3.bf16.msra.mxu0 %v6006_v55 }
 0x12d   : > { %5534 = vmatpush3.bf16.msra.mxu1 %v6007_v60  ;;  %5515 = vmatprep.subr.bf16.mxu0 %v6173_v1  ;;  %v6039_v60 = vld [vmem:[%s7532_s6 + $0x170] sm:$0xff]  }
 0x12e   : > { %5535 = vmatprep.subr.bf16.mxu1 %v6173_v1 }
 0x130   : > { %5516 = vmatpush3.bf16.msra.mxu0 %v6008_v0  ;;  %v6041_v0 = vld [vmem:[%s7532_s6 + $0x178] sm:$0xff]  }
 0x131   : > { %5536 = vmatpush3.bf16.msra.mxu1 %v6009_v3  ;;  %5541 = vmatprep.subr.bf16.mxu0 %v6173_v1  ;;  %v6043_v3 = vld [vmem:[%s7532_s6 + $0x1c0] sm:$0xff]  }
 0x132   : > { %5561 = vmatprep.subr.bf16.mxu1 %v6173_v1 }
 0x133   : > { %5518 = vmatmul.mubr.bf16.vlgmr.msra.gmra.mrb[32].mxu0 %v6984_v5 }
 0x134   : > { %5538 = vmatmul.mubr.bf16.vlgmr.msra.gmra.mrb[32].mxu1 %v6984_v5  ;;  %5542 = vmatpush3.bf16.msra.mxu0 %v6010_v4  ;;  %v6044_v4 = vld [vmem:[%s7532_s6 + $0x188] sm:$0xff]  }
 0x135   : > { %5562 = vmatpush3.bf16.msra.mxu1 %v6011_v6  ;;  %5543 = vmatprep.subr.bf16.mxu0 %v6173_v1  ;;  %v6045_v6 = vld [vmem:[%s7532_s6 + $0x1c8] sm:$0xff]  }
 0x136   : > { %5563 = vmatprep.subr.bf16.mxu1 %v6173_v1  ;;  %5557 = vmatprep.mubr.msk.bf16.mxu0 %vm6174_vm0, %v6173_v1 }
 0x137   : > { %5577 = vmatprep.mubr.msk.bf16.mxu1 %vm6174_vm0, %v6173_v1 }
 0x138   : > { %5544 = vmatpush3.bf16.msra.mxu0 %v6012_v7  ;;  %v6046_v7 = vld [vmem:[%s7532_s6 + $0x190] sm:$0xff]  }
 0x139   : > { %5564 = vmatpush3.bf16.msra.mxu1 %v6013_v8  ;;  %5545 = vmatprep.subr.bf16.mxu0 %v6173_v1  ;;  %v6047_v8 = vld [vmem:[%s7532_s6 + $0x1d0] sm:$0xff]  }
 0x13a   : > { %5565 = vmatprep.subr.bf16.mxu1 %v6173_v1 }
 0x13c   : > { %5546 = vmatpush3.bf16.msra.mxu0 %v6014_v9  ;;  %v6048_v9 = vld [vmem:[%s7532_s6 + $0x198] sm:$0xff]  }
 0x13d   : > { %5566 = vmatpush3.bf16.msra.mxu1 %v6015_v10  ;;  %5547 = vmatprep.subr.bf16.mxu0 %v6173_v1  ;;  %v6049_v10 = vld [vmem:[%s7532_s6 + $0x1d8] sm:$0xff]  }
 0x13e   : > { %5567 = vmatprep.subr.bf16.mxu1 %v6173_v1 }
 0x140   : > { %5548 = vmatpush3.bf16.msra.mxu0 %v6016_v11  ;;  %v6050_v11 = vld [vmem:[%s7532_s6 + $0x1a0] sm:$0xff]  }
 0x141   : > { %5568 = vmatpush3.bf16.msra.mxu1 %v6017_v12  ;;  %5549 = vmatprep.subr.bf16.mxu0 %v6173_v1  ;;  %v6051_v12 = vld [vmem:[%s7532_s6 + $0x1e0] sm:$0xff]  }
 0x142   : > { %5569 = vmatprep.subr.bf16.mxu1 %v6173_v1 }
 0x144   : > { %5550 = vmatpush3.bf16.msra.mxu0 %v6018_v13  ;;  %v4740_v13 = vld [vmem:[%s7537_s11] ss:$0 sm:$0xff] }
 0x145   : > { %5570 = vmatpush3.bf16.msra.mxu1 %v6019_v14  ;;  %5551 = vmatprep.subr.bf16.mxu0 %v6173_v1  ;;  %v6052_v14 = vld [vmem:[%s7532_s6 + $0x1a8] sm:$0xff]  }
 0x146   : > { %v1158_v20 = vpop.f32.mrb[8].mxu0  ;;  %5571 = vmatprep.subr.bf16.mxu1 %v6173_v1 }
 0x147   : > { %v1159_v21 = vadd.f32 %v4672_v15, %v1158_v20  ;;  %v5279_v22 = vpop.f32.mrb[9].mxu0  ;;  %v1246_v23 = vpop.f32.mrb[8].mxu1  ;;  %v4741_v15 = vld [vmem:[%s7537_s11 + $0x1] ss:$0 sm:$0xff] }
 0x148   : > { %v1161_v24 = vpop.f32.mrb[10].mxu0  ;;  %v1247_v25 = vadd.f32 %v4673_v17, %v1246_v23  ;;  %5552 = vmatpush3.bf16.msra.mxu0 %v6020_v16  ;;  %v5299_v26 = vpop.f32.mrb[9].mxu1  ;;  %v6053_v16 = vld [vmem:[%s7532_s6 + $0x1e8] sm:$0xff]  }
 0x149   : > { %v2320_v28 = vpack.c.bf16 %v1159_v21, %v1159_v21  ;;  %5572 = vmatpush3.bf16.msra.mxu1 %v6021_v19  ;;  %v5280_v29 = vpop.f32.mrb[11].mxu0  ;;  %v1249_v30 = vpop.f32.mrb[10].mxu1  ;;  %5553 = vmatprep.subr.bf16.mxu0 %v6173_v1 }
 0x14a   : > { %v2321_v32 = vpack.c.bf16 %v1247_v25, %v1247_v25  ;;  %v5300_v33 = vpop.f32.mrb[11].mxu1  ;;  %5573 = vmatprep.subr.bf16.mxu1 %v6173_v1  ;;  %v6054_v25 = vld [vmem:[%s7532_s6 + $0x1b0] sm:$0xff]  }
 0x14b   : > { %2329 = vst.msk [vmem:[#allocation2 + $0x10] sm:$0xf] %vm2324_vm1, %v2320_v28  ;;  %v6055_v29 = vld [vmem:[%s7532_s6 + $0x1f0] sm:$0xff]   ;;  %v6057_v33 = vld [vmem:[%s7532_s6 + $0x1f8] sm:$0xff]  }
 0x14c   : > { %2330 = vst.msk [vmem:[#allocation2 + $0x14] sm:$0xf] %vm2324_vm1, %v2321_v32  ;;  %5554 = vmatpush3.bf16.msra.mxu0 %v6022_v27  ;;  %v6056_v32 = vld [vmem:[%s7532_s6 + $0x1b8] sm:$0xff]  }
 0x14d   : > { %5574 = vmatpush3.bf16.msra.mxu1 %v6023_v31  ;;  %5555 = vmatprep.subr.bf16.mxu0 %v6173_v1 }
 0x14e   : > { %5575 = vmatprep.subr.bf16.mxu1 %v6173_v1 }
 0x150   : > { %5556 = vmatpush3.bf16.msra.mxu0 %v6024_v18  ;;  %v3294_v18 = vld [vmem:[#allocation2] sm:$0xf] }
 0x151   : > { %5576 = vmatpush3.bf16.msra.mxu1 %v6025_v34  ;;  %5581 = vmatprep.subr.bf16.mxu0 %v6173_v1  ;;  %v3295_v34 = vld [vmem:[#allocation2 + $0x4] sm:$0xf] }
 0x152   : > { %5601 = vmatprep.subr.bf16.mxu1 %v6173_v1 }
 0x153   : > { %5558 = vmatmul.mubr.bf16.vlgmr.msra.gmra.mrb[36].mxu0 %v6984_v5 }
 0x154   : > { %5578 = vmatmul.mubr.bf16.vlgmr.msra.gmra.mrb[36].mxu1 %v6984_v5  ;;  %5582 = vmatpush3.bf16.msra.mxu0 %v6026_v35  ;;  %v3315_v35 = vsel %vm3310_vm2, %v3294_v18, 0 }
 0x155   : > { %5602 = vmatpush3.bf16.msra.mxu1 %v6027_v36  ;;  %5583 = vmatprep.subr.bf16.mxu0 %v6173_v1  ;;  %v3361_v36 = vsel %vm3310_vm2, %v3295_v34, 0 }
 0x156   : > { %5603 = vmatprep.subr.bf16.mxu1 %v6173_v1  ;;  %5597 = vmatprep.mubr.msk.bf16.mxu0 %vm6174_vm0, %v6173_v1 }
 0x157   : > { %5617 = vmatprep.mubr.msk.bf16.mxu1 %vm6174_vm0, %v6173_v1 }
 0x158   : > { %5584 = vmatpush3.bf16.msra.mxu0 %v6028_v37  ;;  %v4743_v37 = vld [vmem:[%s7537_s11 + $0x3] ss:$0 sm:$0xff] }
 0x159   : > { %5604 = vmatpush3.bf16.msra.mxu1 %v6029_v38  ;;  %5585 = vmatprep.subr.bf16.mxu0 %v6173_v1 }
 0x15a   : > { %5605 = vmatprep.subr.bf16.mxu1 %v6173_v1 }
 0x15c   : > { %5586 = vmatpush3.bf16.msra.mxu0 %v6030_v39 }
 0x15d   : > { %5606 = vmatpush3.bf16.msra.mxu1 %v6031_v40  ;;  %5587 = vmatprep.subr.bf16.mxu0 %v6173_v1 }
 0x15e   : > { %5607 = vmatprep.subr.bf16.mxu1 %v6173_v1 }
 0x160   : > { %5588 = vmatpush3.bf16.msra.mxu0 %v6032_v41 }
 0x161   : > { %5608 = vmatpush3.bf16.msra.mxu1 %v6033_v42  ;;  %5589 = vmatprep.subr.bf16.mxu0 %v6173_v1 }
 0x162   : > { %5609 = vmatprep.subr.bf16.mxu1 %v6173_v1 }
 0x164   : > { %5590 = vmatpush3.bf16.msra.mxu0 %v6034_v43 }
 0x165   : > { %5610 = vmatpush3.bf16.msra.mxu1 %v6035_v44  ;;  %5591 = vmatprep.subr.bf16.mxu0 %v6173_v1 }
 0x166   : > { %v1334_v49 = vpop.f32.mrb[12].mxu0  ;;  %5611 = vmatprep.subr.bf16.mxu1 %v6173_v1 }
 0x167   : > { %v1335_v50 = vadd.f32 %v4674_v45, %v1334_v49  ;;  %v5319_v51 = vpop.f32.mrb[13].mxu0  ;;  %v1422_v52 = vpop.f32.mrb[12].mxu1 }
 0x168   : > { %v1337_v53 = vpop.f32.mrb[14].mxu0  ;;  %v1423_v54 = vadd.f32 %v4675_v47, %v1422_v52  ;;  %5592 = vmatpush3.bf16.msra.mxu0 %v6036_v46  ;;  %v5339_v55 = vpop.f32.mrb[13].mxu1  ;;  %v4745_v51 = vld [vmem:[%s7537_s11 + $0x5] ss:$0 sm:$0xff] }
 0x169   : > { %v2322_v57 = vpack.c.bf16 %v1335_v50, %v1335_v50  ;;  %5612 = vmatpush3.bf16.msra.mxu1 %v6037_v48  ;;  %v5320_v58 = vpop.f32.mrb[15].mxu0  ;;  %v1425_v59 = vpop.f32.mrb[14].mxu1  ;;  %5593 = vmatprep.subr.bf16.mxu0 %v6173_v1  ;;  %v4744_v50 = vld [vmem:[%s7537_s11 + $0x4] ss:$0 sm:$0xff] }
 0x16a   : > { %v2323_v61 = vpack.c.bf16 %v1423_v54, %v1423_v54  ;;  %v5340_v62 = vpop.f32.mrb[15].mxu1  ;;  %5613 = vmatprep.subr.bf16.mxu1 %v6173_v1 }
 0x16b   : > { %2331 = vst.msk [vmem:[#allocation2 + $0x18] sm:$0xf] %vm2324_vm1, %v2322_v57 }
 0x16c   : > { %2332 = vst.msk [vmem:[#allocation2 + $0x1c] sm:$0xf] %vm2324_vm1, %v2323_v61  ;;  %5594 = vmatpush3.bf16.msra.mxu0 %v6038_v56 }
 0x16d   : > { %5614 = vmatpush3.bf16.msra.mxu1 %v6039_v60  ;;  %5595 = vmatprep.subr.bf16.mxu0 %v6173_v1 }
 0x16e   : > { %5615 = vmatprep.subr.bf16.mxu1 %v6173_v1 }
 0x170   : > { %5596 = vmatpush3.bf16.msra.mxu0 %v6040_v63 }
 0x171   : > { %5616 = vmatpush3.bf16.msra.mxu1 %v6041_v0  ;;  %5621 = vmatprep.subr.bf16.mxu0 %v6173_v1  ;;  %v6175_v0 = vmov 0  }
 0x172   : > { %5641 = vmatprep.subr.bf16.mxu1 %v6173_v1  ;;  %5864 = vset.pattern.permute.xlu1 %v6175_v0 }
 0x173   : > { %5598 = vmatmul.mubr.bf16.vlgmr.msra.gmra.mrb[40].mxu0 %v6984_v5  ;;  %5865 = vset.pattern.permute.xlu0 %v6175_v0 }
 0x174   : > { %5618 = vmatmul.mubr.bf16.vlgmr.msra.gmra.mrb[40].mxu1 %v6984_v5  ;;  %5622 = vmatpush3.bf16.msra.mxu0 %v6042_v2  ;;  %v3276_v2 = vld [vmem:[%s532_s20] sm:$0xff]  ;;  %s514_s20 = scalar_lea.vmem [#allocation4], %s4664_s21  ;;  %s6177_s21 = smov [#allocation4]  }
 0x175   : > { %5642 = vmatpush3.bf16.msra.mxu1 %v6043_v3  ;;  %5623 = vmatprep.subr.bf16.mxu0 %v6173_v1  ;;  %v4746_v3 = vld [vmem:[%s7537_s11 + $0x6] ss:$0 sm:$0xff]  ;;  %s4561_s24 = sshll.u32 %s514_s20, 4  ;;  %s6097_s28 = sshll.u32 %s6177_s21, 4  ;;  %s7481_s24 = int_to_ptr.vmem [resolvable:$true] %s4561_s24  ;;  %s6098_s28 = int_to_ptr.vmem [resolvable:$false] %s6097_s28 }
 0x176   : > { %5643 = vmatprep.subr.bf16.mxu1 %v6173_v1  ;;  %5637 = vmatprep.mubr.msk.bf16.mxu0 %vm6174_vm0, %v6173_v1  ;;  %s6093_s16 = scalar_lea.vmem %s7481_s24, 128  ;;  %s6099_s19 = scalar_lea.vmem %s6098_s28, 256 }
 0x177   : > { %5657 = vmatprep.mubr.msk.bf16.mxu1 %vm6174_vm0, %v6173_v1  ;;  %3279 = vperm.xlu1 %5864, %v3276_v2   ;;  %p6094_p12 = scmp.ne.s32.totalorder %s7481_s24, %s6093_s16  ;;  %p6100_p1 = scmp.lt.s32.totalorder %s7481_s24, %s6098_s28 }
 0x178   : > { %5624 = vmatpush3.bf16.msra.mxu0 %v6044_v4  ;;  %v4747_v4 = vld [vmem:[%s7537_s11 + $0x7] ss:$0 sm:$0xff]  ;;  %p6101_p2 = scmp.lt.s32.totalorder %s6099_s19, %s6093_s16 }
 0x179   : > { %5644 = vmatpush3.bf16.msra.mxu1 %v6045_v6  ;;  %5625 = vmatprep.subr.bf16.mxu0 %v6173_v1  ;;  %p6095_p13 = pnand %p6094_p12, %p6293_p4 }
 0x17a   : > { %5645 = vmatprep.subr.bf16.mxu1 %v6173_v1  ;;  %p6102_p3 = por %p6101_p2, %p6100_p1 }
 0x17b   : > { %p6096_p0 = pneg %p6095_p13 }
 0x17c   : > { %5626 = vmatpush3.bf16.msra.mxu0 %v6046_v7 }
 0x17d   : > { %5646 = vmatpush3.bf16.msra.mxu1 %v6047_v8  ;;  %5627 = vmatprep.subr.bf16.mxu0 %v6173_v1  ;;  %p6103_p5 = pnand %p6102_p3, %p6096_p0 }
 0x17e   : > { %5647 = vmatprep.subr.bf16.mxu1 %v6173_v1 }
 0x180   : > { %5628 = vmatpush3.bf16.msra.mxu0 %v6048_v9 }
 0x181   : > { %5648 = vmatpush3.bf16.msra.mxu1 %v6049_v10  ;;  %5629 = vmatprep.subr.bf16.mxu0 %v6173_v1 }
 0x182   : > { %5649 = vmatprep.subr.bf16.mxu1 %v6173_v1 }
 0x184   : > { %5630 = vmatpush3.bf16.msra.mxu0 %v6050_v11 }
 0x185   : > { %5650 = vmatpush3.bf16.msra.mxu1 %v6051_v12  ;;  %5631 = vmatprep.subr.bf16.mxu0 %v6173_v1 }
 0x186   : > { %v1694_v17 = vpop.f32.mrb[16].mxu0  ;;  %5651 = vmatprep.subr.bf16.mxu1 %v6173_v1 }
 0x187   : > { %v1695_v19 = vadd.f32 %v4740_v13, %v1694_v17  ;;  %v5359_v20 = vpop.f32.mrb[17].mxu0  ;;  %v1782_v21 = vpop.f32.mrb[16].mxu1 }
 0x188   : > { %v1697_v22 = vpop.f32.mrb[18].mxu0  ;;  %v1783_v23 = vadd.f32 %v4741_v15, %v1782_v21  ;;  %5632 = vmatpush3.bf16.msra.mxu0 %v6052_v14  ;;  %v5379_v24 = vpop.f32.mrb[17].mxu1  ;;  %v4815_v20 = vld [vmem:[%s7533_s7 + $0x1] ss:$0 sm:$0xff] }
 0x189   : > { %v2333_v26 = vpack.c.bf16 %v1695_v19, %v1695_v19  ;;  %5652 = vmatpush3.bf16.msra.mxu1 %v6053_v16  ;;  %v5360_v27 = vpop.f32.mrb[19].mxu0  ;;  %v1785_v28 = vpop.f32.mrb[18].mxu1  ;;  %5633 = vmatprep.subr.bf16.mxu0 %v6173_v1  ;;  %v4814_v19 = vld [vmem:[%s7533_s7] ss:$0 sm:$0xff] }
 0x18a   : > { %v2334_v30 = vpack.c.bf16 %v1783_v23, %v1783_v23  ;;  %v5380_v31 = vpop.f32.mrb[19].mxu1  ;;  %5653 = vmatprep.subr.bf16.mxu1 %v6173_v1  ;;  %v3296_v28 = vld [vmem:[#allocation2 + $0x8] sm:$0xf] }
 0x18b   : > { %2341 = vst.msk [vmem:[#allocation3] sm:$0xf] %vm2324_vm1, %v2333_v26  ;;  %v3407_v34 = vsel %vm3310_vm2, %v3296_v28, 0  ;;  %v4886_v28 = vld [vmem:[%s7529_s3] ss:$0 sm:$0xff] }
 0x18c   : > { %2342 = vst.msk [vmem:[#allocation3 + $0x4] sm:$0xf] %vm2324_vm1, %v2334_v30  ;;  %5634 = vmatpush3.bf16.msra.mxu0 %v6054_v25 }
 0x18d   : > { %5654 = vmatpush3.bf16.msra.mxu1 %v6055_v29  ;;  %5635 = vmatprep.subr.bf16.mxu0 %v6173_v1 }
 0x18e   : > { %5655 = vmatprep.subr.bf16.mxu1 %v6173_v1 }
 0x190   : > { %5636 = vmatpush3.bf16.msra.mxu0 %v6056_v32  ;;  %v3297_v32 = vld [vmem:[#allocation2 + $0xc] sm:$0xf] }
 0x191   : > { %5656 = vmatpush3.bf16.msra.mxu1 %v6057_v33  ;;  %5661 = vmatprep.subr.bf16.mxu0 %v6173_v1 }
 0x192   : > { %5667 = vmatprep.subr.bf16.mxu1 %v6173_v1 }
 0x193   : > { %5638 = vmatmul.mubr.bf16.vlgmr.msra.gmra.mrb[44].mxu0 %v6984_v5 }
 0x194   : > { %5658 = vmatmul.mubr.bf16.vlgmr.msra.gmra.mrb[44].mxu1 %v6984_v5  ;;  %5663 = vmatprep.mubr.msk.bf16.mxu0 %vm6174_vm0, %v6173_v1  ;;  %v4742_v5 = vld [vmem:[%s7537_s11 + $0x2] ss:$0 sm:$0xff] }
 0x195   : > { %5669 = vmatprep.mubr.msk.bf16.mxu1 %vm6174_vm0, %v6173_v1 }
 0x199   : > { %5662 = vmatpush3.bf16.xpose.msra.mxu0 %v3315_v35  ;;  %v3453_v35 = vsel %vm3310_vm2, %v3297_v32, 0 }
 0x19a   : > { %5668 = vmatpush3.bf16.xpose.msra.mxu1 %v3361_v36  ;;  %5673 = vmatprep.subr.bf16.mxu0 %v6173_v1  ;;  %v4816_v36 = vld [vmem:[%s7533_s7 + $0x2] ss:$0 sm:$0xff] }
 0x19b   : > { %5679 = vmatprep.subr.bf16.mxu1 %v6173_v1 }
 0x1a6   : > { %v1870_v38 = vpop.f32.mrb[20].mxu0 }
 0x1a7   : > { %v1871_v39 = vadd.f32 %v4742_v5, %v1870_v38  ;;  %v5399_v40 = vpop.f32.mrb[21].mxu0  ;;  %v1958_v41 = vpop.f32.mrb[20].mxu1  ;;  %v4817_v5 = vld [vmem:[%s7533_s7 + $0x3] ss:$0 sm:$0xff] }
 0x1a8   : > { %v1873_v42 = vpop.f32.mrb[22].mxu0  ;;  %v1959_v43 = vadd.f32 %v4743_v37, %v1958_v41  ;;  %v5419_v44 = vpop.f32.mrb[21].mxu1 }
 0x1a9   : > { %v2335_v45 = vpack.c.bf16 %v1871_v39, %v1871_v39  ;;  %v5400_v46 = vpop.f32.mrb[23].mxu0  ;;  %v1961_v47 = vpop.f32.mrb[22].mxu1  ;;  %v3298_v44 = vld [vmem:[#allocation2 + $0x10] sm:$0xf] }
 0x1aa   : > { %v2336_v48 = vpack.c.bf16 %v1959_v43, %v1959_v43  ;;  %v5420_v49 = vpop.f32.mrb[23].mxu1 }
 0x1ab   : > { %2343 = vst.msk [vmem:[#allocation3 + $0x8] sm:$0xf] %vm2324_vm1, %v2335_v45 }
 0x1ac   : > { %2344 = vst.msk [vmem:[#allocation3 + $0xc] sm:$0xf] %vm2324_vm1, %v2336_v48  ;;  %v3299_v48 = vld [vmem:[#allocation2 + $0x14] sm:$0xf] }
 0x1c6   : > { %v2046_v52 = vpop.f32.mrb[24].mxu0 }
 0x1c7   : > { %v2047_v53 = vadd.f32 %v4744_v50, %v2046_v52  ;;  %v5439_v54 = vpop.f32.mrb[25].mxu0  ;;  %v2134_v55 = vpop.f32.mrb[24].mxu1  ;;  %v3545_v52 = vsel %vm3310_vm2, %v3299_v48, 0 }
 0x1c8   : > { %v2049_v56 = vpop.f32.mrb[26].mxu0  ;;  %v2135_v57 = vadd.f32 %v4745_v51, %v2134_v55  ;;  %v5459_v58 = vpop.f32.mrb[25].mxu1  ;;  %v3499_v51 = vsel %vm3310_vm2, %v3298_v44, 0  ;;  %v4819_v54 = vld [vmem:[%s7533_s7 + $0x5] ss:$0 sm:$0xff] }
 0x1c9   : > { %v2337_v59 = vpack.c.bf16 %v2047_v53, %v2047_v53  ;;  %v5440_v60 = vpop.f32.mrb[27].mxu0  ;;  %v2137_v61 = vpop.f32.mrb[26].mxu1  ;;  %v4818_v53 = vld [vmem:[%s7533_s7 + $0x4] ss:$0 sm:$0xff] }
 0x1ca   : > { %v2338_v62 = vpack.c.bf16 %v2135_v57, %v2135_v57  ;;  %v5460_v63 = vpop.f32.mrb[27].mxu1 }
 0x1cb   : > { %2345 = vst.msk [vmem:[#allocation3 + $0x10] sm:$0xf] %vm2324_vm1, %v2337_v59 }
 0x1cc   : > { %2346 = vst.msk [vmem:[#allocation3 + $0x14] sm:$0xf] %vm2324_vm1, %v2338_v62  ;;  %v3300_v62 = vld [vmem:[#allocation2 + $0x18] sm:$0xf] }
 0x1e6   : > { %v2222_v6 = vpop.f32.mrb[28].mxu0 }
 0x1e7   : > { %v2223_v7 = vadd.f32 %v4746_v3, %v2222_v6  ;;  %v5479_v8 = vpop.f32.mrb[29].mxu0  ;;  %v2310_v9 = vpop.f32.mrb[28].mxu1  ;;  %v3301_v3 = vld [vmem:[#allocation2 + $0x1c] sm:$0xf] }
 0x1e8   : > { %v2225_v10 = vpop.f32.mrb[30].mxu0  ;;  %v2311_v11 = vadd.f32 %v4747_v4, %v2310_v9  ;;  %v5499_v12 = vpop.f32.mrb[29].mxu1  ;;  %v3637_v8 = vsel %vm3310_vm2, %v3301_v3, 0  ;;  %v4820_v9 = vld [vmem:[%s7533_s7 + $0x6] ss:$0 sm:$0xff] }
 0x1e9   : > { %v2339_v13 = vpack.c.bf16 %v2223_v7, %v2223_v7  ;;  %v5480_v14 = vpop.f32.mrb[31].mxu0  ;;  %v2313_v15 = vpop.f32.mrb[30].mxu1  ;;  %v3591_v7 = vsel %vm3310_vm2, %v3300_v62, 0  ;;  %v4821_v10 = vld [vmem:[%s7533_s7 + $0x7] ss:$0 sm:$0xff] }
 0x1ea   : > { %v2340_v16 = vpack.c.bf16 %v2311_v11, %v2311_v11  ;;  %v5500_v17 = vpop.f32.mrb[31].mxu1 }
 0x1eb   : > { %2347 = vst.msk [vmem:[#allocation3 + $0x18] sm:$0xf] %vm2324_vm1, %v2339_v13 }
 0x1ec   : > { %2348 = vst.msk [vmem:[#allocation3 + $0x1c] sm:$0xf] %vm2324_vm1, %v2340_v16 }
 0x206   : > { %v2646_v21 = vpop.f32.mrb[32].mxu0 }
 0x207   : > { %v2647_v22 = vadd.f32 %v4814_v19, %v2646_v21  ;;  %v2734_v23 = vpop.f32.mrb[32].mxu1  ;;  %v5519_v24 = vpop.f32.mrb[33].mxu0  ;;  %v3302_v19 = vld [vmem:[#allocation3] sm:$0xf] }
 0x208   : > { %v2735_v25 = vadd.f32 %v4815_v20, %v2734_v23  ;;  %v5539_v26 = vpop.f32.mrb[33].mxu1  ;;  %v2649_v27 = vpop.f32.mrb[34].mxu0  ;;  %v3303_v23 = vld [vmem:[#allocation3 + $0x4] sm:$0xf] }
 0x209   : > { %v3268_v29 = vpack.c.bf16 %v2647_v22, %v2647_v22  ;;  %v2737_v30 = vpop.f32.mrb[34].mxu1  ;;  %v5520_v31 = vpop.f32.mrb[35].mxu0  ;;  %v3764_v26 = vsel %vm3762_vm3, %v3302_v19, 0  ;;  %v3810_v27 = vsel %vm3762_vm3, %v3303_v23, 0 }
 0x20a   : > { %v3269_v33 = vpack.c.bf16 %v2735_v25, %v2735_v25  ;;  %v5540_v18 = vpop.f32.mrb[35].mxu1  ;;  %v6176_v30 = vmov -1e+30  }
 0x20b   : > { %5664 = vmatmul.mubr.msk.bf16.vlgmr.msra.gmra.mrb[48].mxu0 %vm3310_vm2, %v3268_v29  ;;  %v3280_v29 = vpop.permute.xlu1 %3279 }
 0x20c   : > { %5670 = vmatmul.mubr.msk.bf16.vlgmr.msra.gmra.mrb[48].mxu1 %vm3310_vm2, %v3269_v33  ;;  %5674 = vmatpush3.bf16.xpose.msra.mxu0 %v3407_v34  ;;  %vm3285_vm4 = vcmp.eq.s32.totalorder %v3280_v29, %v4886_v28  ;;  %v3305_v28 = vld [vmem:[#allocation3 + $0xc] sm:$0xf] }
 0x20d   : > { %5680 = vmatpush3.bf16.xpose.msra.mxu1 %v3453_v35  ;;  %5675 = vmatprep.mubr.msk.bf16.mxu0 %vm6174_vm0, %v6173_v1  ;;  %v7324_v31 = vsel %vm3285_vm4, 0.0, %v6176_v30 }
 0x20e   : > { %5681 = vmatprep.mubr.msk.bf16.mxu1 %vm6174_vm0, %v6173_v1  ;;  %5685 = vmatprep.subr.bf16.mxu0 %v6173_v1 }
 0x20f   : > { %5691 = vmatprep.subr.bf16.mxu1 %v6173_v1 }
 0x226   : > { %v2822_v37 = vpop.f32.mrb[36].mxu0 }
 0x227   : > { %v2823_v38 = vadd.f32 %v4816_v36, %v2822_v37  ;;  %v2910_v39 = vpop.f32.mrb[36].mxu1  ;;  %v5559_v40 = vpop.f32.mrb[37].mxu0 }
 0x228   : > { %v2911_v41 = vadd.f32 %v4817_v5, %v2910_v39  ;;  %v5579_v42 = vpop.f32.mrb[37].mxu1  ;;  %v2825_v43 = vpop.f32.mrb[38].mxu0 }
 0x229   : > { %v3270_v45 = vpack.c.bf16 %v2823_v38, %v2823_v38  ;;  %v2913_v46 = vpop.f32.mrb[38].mxu1  ;;  %v5560_v47 = vpop.f32.mrb[39].mxu0 }
 0x22a   : > { %v3271_v49 = vpack.c.bf16 %v2911_v41, %v2911_v41  ;;  %v5580_v50 = vpop.f32.mrb[39].mxu1 }
 0x22b   : > { %5676 = vmatmul.mubr.msk.bf16.vlgmr.msra.gmra.mrb[52].mxu0 %vm3310_vm2, %v3270_v45 }
 0x22c   : > { %5682 = vmatmul.mubr.msk.bf16.vlgmr.msra.gmra.mrb[52].mxu1 %vm3310_vm2, %v3271_v49  ;;  %5686 = vmatpush3.bf16.xpose.msra.mxu0 %v3499_v51 }
 0x22d   : > { %5692 = vmatpush3.bf16.xpose.msra.mxu1 %v3545_v52  ;;  %5687 = vmatprep.mubr.msk.bf16.mxu0 %vm6174_vm0, %v6173_v1 }
 0x22e   : > { %5693 = vmatprep.mubr.msk.bf16.mxu1 %vm6174_vm0, %v6173_v1  ;;  %5697 = vmatprep.subr.bf16.mxu0 %v6173_v1 }
 0x22f   : > { %5703 = vmatprep.subr.bf16.mxu1 %v6173_v1 }
 0x246   : > { %v2998_v55 = vpop.f32.mrb[40].mxu0 }
 0x247   : > { %v2999_v56 = vadd.f32 %v4818_v53, %v2998_v55  ;;  %v3086_v57 = vpop.f32.mrb[40].mxu1  ;;  %v5599_v58 = vpop.f32.mrb[41].mxu0 }
 0x248   : > { %v3087_v59 = vadd.f32 %v4819_v54, %v3086_v57  ;;  %v5619_v60 = vpop.f32.mrb[41].mxu1  ;;  %v3001_v61 = vpop.f32.mrb[42].mxu0 }
 0x249   : > { %v3272_v63 = vpack.c.bf16 %v2999_v56, %v2999_v56  ;;  %v3089_v0 = vpop.f32.mrb[42].mxu1  ;;  %v5600_v2 = vpop.f32.mrb[43].mxu0 }
 0x24a   : > { %v3273_v4 = vpack.c.bf16 %v3087_v59, %v3087_v59  ;;  %v5620_v6 = vpop.f32.mrb[43].mxu1 }
 0x24b   : > { %5688 = vmatmul.mubr.msk.bf16.vlgmr.msra.gmra.mrb[56].mxu0 %vm3310_vm2, %v3272_v63 }
 0x24c   : > { %5694 = vmatmul.mubr.msk.bf16.vlgmr.msra.gmra.mrb[56].mxu1 %vm3310_vm2, %v3273_v4  ;;  %5698 = vmatpush3.bf16.xpose.msra.mxu0 %v3591_v7 }
 0x24d   : > { %5704 = vmatpush3.bf16.xpose.msra.mxu1 %v3637_v8  ;;  %5699 = vmatprep.mubr.msk.bf16.mxu0 %vm6174_vm0, %v6173_v1 }
 0x24e   : > { %5705 = vmatprep.mubr.msk.bf16.mxu1 %vm6174_vm0, %v6173_v1  ;;  %5709 = vmatprep.subr.bf16.mxu0 %v6173_v1 }
 0x24f   : > { %5715 = vmatprep.subr.bf16.mxu1 %v6173_v1 }
 0x266   : > { %v3174_v11 = vpop.f32.mrb[44].mxu0 }
 0x267   : > { %v3175_v12 = vadd.f32 %v4820_v9, %v3174_v11  ;;  %v3262_v13 = vpop.f32.mrb[44].mxu1  ;;  %v5639_v14 = vpop.f32.mrb[45].mxu0 }
 0x268   : > { %v3263_v15 = vadd.f32 %v4821_v10, %v3262_v13  ;;  %v5659_v16 = vpop.f32.mrb[45].mxu1  ;;  %v3177_v17 = vpop.f32.mrb[46].mxu0 }
 0x269   : > { %v3274_v20 = vpack.c.bf16 %v3175_v12, %v3175_v12  ;;  %v3265_v21 = vpop.f32.mrb[46].mxu1  ;;  %v5640_v22 = vpop.f32.mrb[47].mxu0 }
 0x26a   : > { %v3275_v24 = vpack.c.bf16 %v3263_v15, %v3263_v15  ;;  %v5660_v25 = vpop.f32.mrb[47].mxu1 }
 0x26b   : > { %5700 = vmatmul.mubr.msk.bf16.vlgmr.msra.gmra.mrb[60].mxu0 %vm3310_vm2, %v3274_v20 }
 0x26c   : > { %5706 = vmatmul.mubr.msk.bf16.vlgmr.msra.gmra.mrb[60].mxu1 %vm3310_vm2, %v3275_v24  ;;  %5710 = vmatpush3.bf16.msra.mxu0 %v3764_v26  ;;  %v3304_v24 = vld [vmem:[#allocation3 + $0x8] sm:$0xf] }
 0x26d   : > { %5716 = vmatpush3.bf16.msra.mxu1 %v3810_v27  ;;  %5711 = vmatprep.mubr.msk.bf16.mxu0 %vm6174_vm0, %v6173_v1  ;;  %v3856_v30 = vsel %vm3762_vm3, %v3304_v24, 0 }
 0x26e   : > { %5717 = vmatprep.mubr.msk.bf16.mxu1 %vm6174_vm0, %v6173_v1  ;;  %5721 = vmatprep.subr.bf16.mxu0 %v6173_v1 }
 0x26f   : > { %5727 = vmatprep.subr.bf16.mxu1 %v6173_v1 }
 0x2de   : > { %v3351_v32 = vpop.f32.mrb[48].mxu0 }
 0x2df   : > { %v3352_v33 = vadd.f32 %v3351_v32, %v7324_v31  ;;  %v3397_v18 = vpop.f32.mrb[48].mxu1  ;;  %v5665_v34 = vpop.f32.mrb[49].mxu0  ;;  %v3902_v32 = vsel %vm3762_vm3, %v3305_v28, 0  ;;  %v4155_v28 = vld [vmem:[%s7538_s12 + $0x6] sm:$0x3] }
 0x2e0   : > { %v3398_v35 = vadd.f32 %v3397_v18, %v7324_v31  ;;  %v5671_v36 = vpop.f32.mrb[49].mxu1  ;;  %v3354_v5 = vpop.f32.mrb[50].mxu0 }
 0x2e1   : > { %v3400_v37 = vpop.f32.mrb[50].mxu1  ;;  %v5666_v38 = vpop.f32.mrb[51].mxu0  ;;  %v3679_v39 = vsel %vm3287_vm5, %v3352_v33, -inf }
 0x2e2   : > { %v5672_v40 = vpop.f32.mrb[51].mxu1  ;;  %v3682_v41 = vsel %vm3287_vm5, %v3398_v35, -inf  ;;  %3680 = vmax.xlane.f32.xlu1 %v3679_v39  ;;  %v3306_v39 = vld [vmem:[#allocation3 + $0x10] sm:$0xf] }
 0x2e3   : > { %3683 = vmax.xlane.f32.xlu0 %v3682_v41 }
 0x2fe   : > { %v3443_v42 = vpop.f32.mrb[52].mxu0 }
 0x2ff   : > { %v7331_v43 = vadd.f32 %v3443_v42, %v7324_v31  ;;  %v3489_v44 = vpop.f32.mrb[52].mxu1  ;;  %v5677_v45 = vpop.f32.mrb[53].mxu0  ;;  %v3948_v42 = vsel %vm3762_vm3, %v3306_v39, 0 }
 0x300   : > { %v5683_v46 = vpop.f32.mrb[53].mxu1  ;;  %v3446_v47 = vpop.f32.mrb[54].mxu0  ;;  %v7334_v48 = vadd.f32 %v3489_v44, %v7324_v31 }
 0x301   : > { %v3492_v49 = vpop.f32.mrb[54].mxu1  ;;  %v5678_v50 = vpop.f32.mrb[55].mxu0  ;;  %v3685_v51 = vsel %vm3287_vm5, %v7331_v43, -inf }
 0x302   : > { %v5684_v52 = vpop.f32.mrb[55].mxu1  ;;  %3686 = vmax.xlane.f32.xlu0 %v3685_v51  ;;  %v3688_v53 = vsel %vm3287_vm5, %v7334_v48, -inf }
 0x306   : > { %3689 = vmax.xlane.f32.xlu0 %v3688_v53 }
 0x31e   : > { %v3535_v54 = vpop.f32.mrb[56].mxu0 }
 0x31f   : > { %v7341_v55 = vadd.f32 %v3535_v54, %v7324_v31  ;;  %v3581_v56 = vpop.f32.mrb[56].mxu1  ;;  %v5689_v57 = vpop.f32.mrb[57].mxu0 }
 0x320   : > { %v5695_v58 = vpop.f32.mrb[57].mxu1  ;;  %v3538_v59 = vpop.f32.mrb[58].mxu0  ;;  %v7344_v60 = vadd.f32 %v3581_v56, %v7324_v31  ;;  %v3308_v56 = vld [vmem:[#allocation3 + $0x18] sm:$0xf] }
 0x321   : > { %v3584_v61 = vpop.f32.mrb[58].mxu1  ;;  %v5690_v62 = vpop.f32.mrb[59].mxu0  ;;  %v3691_v63 = vsel %vm3287_vm5, %v7341_v55, -inf  ;;  %v4040_v59 = vsel %vm3762_vm3, %v3308_v56, 0 }
 0x322   : > { %v5696_v0 = vpop.f32.mrb[59].mxu1  ;;  %3692 = vmax.xlane.f32.xlu0 %v3691_v63  ;;  %v3694_v2 = vsel %vm3287_vm5, %v7344_v60, -inf }
 0x326   : > { %3695 = vmax.xlane.f32.xlu0 %v3694_v2 }
 0x33e   : > { %v3627_v3 = vpop.f32.mrb[60].mxu0 }
 0x33f   : > { %v7351_v4 = vadd.f32 %v3627_v3, %v7324_v31  ;;  %v3673_v6 = vpop.f32.mrb[60].mxu1  ;;  %v5701_v7 = vpop.f32.mrb[61].mxu0 }
 0x340   : > { %v5707_v8 = vpop.f32.mrb[61].mxu1  ;;  %v3630_v9 = vpop.f32.mrb[62].mxu0  ;;  %v7354_v10 = vadd.f32 %v3673_v6, %v7324_v31 }
 0x341   : > { %v3676_v11 = vpop.f32.mrb[62].mxu1  ;;  %v5702_v12 = vpop.f32.mrb[63].mxu0  ;;  %v3697_v13 = vsel %vm3287_vm5, %v7351_v4, -inf  ;;  %v4152_v9 = vld [vmem:[%s7538_s12] sm:$0x3] }
 0x342   : > { %v5708_v14 = vpop.f32.mrb[63].mxu1  ;;  %3698 = vmax.xlane.f32.xlu0 %v3697_v13  ;;  %v3700_v15 = vsel %vm3287_vm5, %v7354_v10, -inf }
 0x343   : > { %v4165_v14 = vsel %vm4163_vm6, %v4152_v9, 0 }
 0x346   : > { %3701 = vmax.xlane.f32.xlu0 %v3700_v15  ;;  %v3288_v15 = vsel %vm3287_vm5, %v7324_v31, -inf }
 0x36f   : > { %v3681_v16 = vpop.xlane.xlu1 %3680 }
 0x370   : > { %v3684_v17 = vpop.xlane.xlu0 %3683  ;;  %v3703_v19 = vsub.f32 %v3352_v33, %v3681_v16 }
 0x371   : > { %v3704_v20 = vsub.f32 %v3398_v35, %v3684_v17 }
 0x372   : > { %v3711_v21 = vmul.f32 1.442695, %v3703_v19 }
 0x373   : > { %v3713_v22 = vmul.f32 1.442695, %v3704_v20 }
 0x374   : > { %6060 = vpow2.f32 %v3711_v21 }
 0x375   : > { %6062 = vpow2.f32 %v3713_v22 }
 0x37e   : > { %v6061_v23 = vpop.eup %6060 }
 0x37f   : > { %v6063_v25 = vpop.eup %6062  ;;  %v3727_v26 = vsel %vm3287_vm5, %v6061_v23, 0.0  ;;  %v3751_v27 = vpack.c.bf16 %v6061_v23, %v6061_v23  ;;  %v4154_v23 = vld [vmem:[%s7538_s12 + $0x4] sm:$0x3] }
 0x380   : > { %3728 = vadd.xlane.f32.xlu0 %v3727_v26  ;;  %v3752_v29 = vpack.c.bf16 %v6063_v25, %v6063_v25  ;;  %v3730_v33 = vsel %vm3287_vm5, %v6063_v25, 0.0 }
 0x381   : > { %5712 = vmatmul.mubr.msk.bf16.vlgmr.msra.gmra.mrb[64].mxu0 %vm3287_vm5, %v3751_v27 }
 0x382   : > { %5718 = vmatmul.mubr.msk.bf16.vlgmr.msra.gmra.mrb[64].mxu1 %vm3287_vm5, %v3752_v29  ;;  %5722 = vmatpush3.bf16.msra.mxu0 %v3856_v30 }
 0x383   : > { %5728 = vmatpush3.bf16.msra.mxu1 %v3902_v32  ;;  %5723 = vmatprep.mubr.msk.bf16.mxu0 %vm6174_vm0, %v6173_v1 }
 0x384   : > { %3731 = vadd.xlane.f32.xlu0 %v3730_v33  ;;  %5733 = vmatprep.subr.bf16.mxu0 %v6173_v1 }
 0x385   : > { %5729 = vmatprep.mubr.msk.bf16.mxu1 %vm6174_vm0, %v6173_v1  ;;  %5739 = vmatprep.subr.bf16.mxu1 %v6173_v1 }
 0x38f   : > { %v3687_v18 = vpop.xlane.xlu0 %3686 }
 0x390   : > { %v3705_v34 = vsub.f32 %v7331_v43, %v3687_v18  ;;  %v3307_v43 = vld [vmem:[#allocation3 + $0x14] sm:$0xf] }
 0x391   : > { %v3994_v47 = vsel %vm3762_vm3, %v3307_v43, 0 }
 0x392   : > { %v3715_v35 = vmul.f32 1.442695, %v3705_v34 }
 0x393   : > { %v3690_v36 = vpop.xlane.xlu0 %3689 }
 0x394   : > { %6064 = vpow2.f32 %v3715_v35  ;;  %v3706_v5 = vsub.f32 %v7334_v48, %v3690_v36  ;;  %v4257_v35 = vsel %vm4163_vm6, %v4154_v23, 0 }
 0x396   : > { %v3717_v37 = vmul.f32 1.442695, %v3706_v5 }
 0x398   : > { %6066 = vpow2.f32 %v3717_v37  ;;  %v4303_v37 = vsel %vm4163_vm6, %v4155_v28, 0 }
 0x39e   : > { %v6065_v38 = vpop.eup %6064 }
 0x39f   : > { %v3733_v40 = vsel %vm3287_vm5, %v6065_v38, 0.0  ;;  %v3753_v41 = vpack.c.bf16 %v6065_v38, %v6065_v38 }
 0x3a0   : > { %3734 = vadd.xlane.f32.xlu1 %v3733_v40 }
 0x3a1   : > { %5724 = vmatmul.mubr.msk.bf16.vlgmr.msra.gmra.mrb[68].mxu0 %vm3287_vm5, %v3753_v41 }
 0x3a2   : > { %v6067_v44 = vpop.eup %6066  ;;  %5734 = vmatpush3.bf16.msra.mxu0 %v3948_v42  ;;  %5735 = vmatprep.mubr.msk.bf16.mxu0 %vm6174_vm0, %v6173_v1  ;;  %v4156_v42 = vld [vmem:[%s7538_s12 + $0x8] sm:$0x3] }
 0x3a3   : > { %v3736_v45 = vsel %vm3287_vm5, %v6067_v44, 0.0  ;;  %v3754_v46 = vpack.c.bf16 %v6067_v44, %v6067_v44  ;;  %5745 = vmatprep.subr.bf16.mxu0 %v6173_v1 }
 0x3a4   : > { %3737 = vadd.xlane.f32.xlu0 %v3736_v45 }
 0x3a5   : > { %5730 = vmatmul.mubr.msk.bf16.vlgmr.msra.gmra.mrb[68].mxu1 %vm3287_vm5, %v3754_v46 }
 0x3a6   : > { %5740 = vmatpush3.bf16.msra.mxu1 %v3994_v47  ;;  %5741 = vmatprep.mubr.msk.bf16.mxu1 %vm6174_vm0, %v6173_v1 }
 0x3a7   : > { %5751 = vmatprep.subr.bf16.mxu1 %v6173_v1 }
 0x3af   : > { %v3693_v48 = vpop.xlane.xlu0 %3692 }
 0x3b0   : > { %v3707_v49 = vsub.f32 %v7341_v55, %v3693_v48  ;;  %v3309_v55 = vld [vmem:[#allocation3 + $0x1c] sm:$0xf]  ;;  %v4349_v48 = vsel %vm4163_vm6, %v4156_v42, 0 }
 0x3b1   : > { %v4086_v63 = vsel %vm3762_vm3, %v3309_v55, 0 }
 0x3b2   : > { %v3719_v50 = vmul.f32 1.442695, %v3707_v49 }
 0x3b3   : > { %v3696_v51 = vpop.xlane.xlu0 %3695 }
 0x3b4   : > { %6068 = vpow2.f32 %v3719_v50  ;;  %v3708_v52 = vsub.f32 %v7344_v60, %v3696_v51  ;;  %v4157_v51 = vld [vmem:[%s7538_s12 + $0xa] sm:$0x3] }
 0x3b6   : > { %v3721_v53 = vmul.f32 1.442695, %v3708_v52 }
 0x3b8   : > { %6070 = vpow2.f32 %v3721_v53 }
 0x3be   : > { %v6069_v54 = vpop.eup %6068 }
 0x3bf   : > { %v3739_v57 = vsel %vm3287_vm5, %v6069_v54, 0.0  ;;  %v3755_v58 = vpack.c.bf16 %v6069_v54, %v6069_v54 }
 0x3c0   : > { %3740 = vadd.xlane.f32.xlu1 %v3739_v57 }
 0x3c1   : > { %5736 = vmatmul.mubr.msk.bf16.vlgmr.msra.gmra.mrb[72].mxu0 %vm3287_vm5, %v3755_v58  ;;  %v4395_v58 = vsel %vm4163_vm6, %v4157_v51, 0 }
 0x3c2   : > { %v6071_v61 = vpop.eup %6070  ;;  %5746 = vmatpush3.bf16.msra.mxu0 %v4040_v59  ;;  %5747 = vmatprep.mubr.msk.bf16.mxu0 %vm6174_vm0, %v6173_v1 }
 0x3c3   : > { %v3742_v60 = vsel %vm3287_vm5, %v6071_v61, 0.0  ;;  %v3756_v62 = vpack.c.bf16 %v6071_v61, %v6071_v61  ;;  %5757 = vmatprep.subr.bf16.mxu0 %v6173_v1 }
 0x3c4   : > { %3743 = vadd.xlane.f32.xlu0 %v3742_v60 }
 0x3c5   : > { %5742 = vmatmul.mubr.msk.bf16.vlgmr.msra.gmra.mrb[72].mxu1 %vm3287_vm5, %v3756_v62  ;;  %v4158_v62 = vld [vmem:[%s7538_s12 + $0xc] sm:$0x3] }
 0x3c6   : > { %5752 = vmatpush3.bf16.msra.mxu1 %v4086_v63  ;;  %5753 = vmatprep.mubr.msk.bf16.mxu1 %vm6174_vm0, %v6173_v1 }
 0x3c7   : > { %5763 = vmatprep.subr.bf16.mxu1 %v6173_v1 }
 0x3cf   : > { %v3699_v0 = vpop.xlane.xlu0 %3698 }
 0x3d0   : > { %v3709_v2 = vsub.f32 %v7351_v4, %v3699_v0  ;;  %v4153_v4 = vld [vmem:[%s7538_s12 + $0x2] sm:$0x3] }
 0x3d1   : > { %v4211_v19 = vsel %vm4163_vm6, %v4153_v4, 0 }
 0x3d2   : > { %v3723_v3 = vmul.f32 1.442695, %v3709_v2 }
 0x3d3   : > { %v3702_v6 = vpop.xlane.xlu0 %3701 }
 0x3d4   : > { %6072 = vpow2.f32 %v3723_v3  ;;  %v3710_v7 = vsub.f32 %v7354_v10, %v3702_v6 }
 0x3d6   : > { %v3725_v8 = vmul.f32 1.442695, %v3710_v7  ;;  %v4441_v7 = vsel %vm4163_vm6, %v4158_v62, 0 }
 0x3d8   : > { %6074 = vpow2.f32 %v3725_v8 }
 0x3de   : > { %v6073_v11 = vpop.eup %6072 }
 0x3df   : > { %v3745_v12 = vsel %vm3287_vm5, %v6073_v11, 0.0  ;;  %v3757_v13 = vpack.c.bf16 %v6073_v11, %v6073_v11  ;;  %v4159_v11 = vld [vmem:[%s7538_s12 + $0xe] sm:$0x3] }
 0x3e0   : > { %3746 = vadd.xlane.f32.xlu1 %v3745_v12 }
 0x3e1   : > { %5748 = vmatmul.mubr.msk.bf16.vlgmr.msra.gmra.mrb[76].mxu0 %vm3287_vm5, %v3757_v13 }
 0x3e2   : > { %v6075_v10 = vpop.eup %6074  ;;  %5758 = vmatpush3.bf16.msra.mxu0 %v4165_v14  ;;  %5759 = vmatprep.mubr.msk.bf16.mxu0 %vm6174_vm0, %v6173_v1 }
 0x3e3   : > { %v3748_v16 = vsel %vm3287_vm5, %v6075_v10, 0.0  ;;  %v3758_v17 = vpack.c.bf16 %v6075_v10, %v6075_v10  ;;  %5769 = vmatprep.subr.bf16.mxu0 %v6173_v1 }
 0x3e4   : > { %3289 = vmax.xlane.f32.xlu1 %v3288_v15  ;;  %3749 = vadd.xlane.f32.xlu0 %v3748_v16  ;;  %v4487_v15 = vsel %vm4163_vm6, %v4159_v11, 0 }
 0x3e5   : > { %5754 = vmatmul.mubr.msk.bf16.vlgmr.msra.gmra.mrb[76].mxu1 %vm3287_vm5, %v3758_v17 }
 0x3e6   : > { %5764 = vmatpush3.bf16.msra.mxu1 %v4211_v19  ;;  %5765 = vmatprep.mubr.msk.bf16.mxu1 %vm6174_vm0, %v6173_v1 }
 0x3e7   : > { %5775 = vmatprep.subr.bf16.mxu1 %v6173_v1 }
 0x40d   : > { %v3729_v20 = vpop.xlane.xlu0 %3728 }
 0x40e   : > { %6076 = vrcp.f32 %v3729_v20 }
 0x411   : > { %v3732_v21 = vpop.xlane.xlu0 %3731 }
 0x412   : > { %6078 = vrcp.f32 %v3732_v21 }
 0x418   : > { %v6077_v31 = vpop.eup %6076 }
 0x41c   : > { %v6079_v24 = vpop.eup %6078 }
 0x42d   : > { %v3735_v38 = vpop.xlane.xlu1 %3734 }
 0x42e   : > { %6080 = vrcp.f32 %v3735_v38 }
 0x431   : > { %v3738_v39 = vpop.xlane.xlu0 %3737 }
 0x432   : > { %6082 = vrcp.f32 %v3738_v39 }
 0x438   : > { %v6081_v40 = vpop.eup %6080 }
 0x43c   : > { %v6083_v49 = vpop.eup %6082 }
 0x44d   : > { %v3741_v59 = vpop.xlane.xlu1 %3740 }
 0x44e   : > { %6084 = vrcp.f32 %v3741_v59 }
 0x451   : > { %v3744_v61 = vpop.xlane.xlu0 %3743 }
 0x452   : > { %6086 = vrcp.f32 %v3744_v61 }
 0x454   : > { %v3800_v22 = vpop.f32.mrb[64].mxu0 }
 0x455   : > { %v4136_v25 = vmul.f32 %v6077_v31, %v3800_v22  ;;  %v3846_v26 = vpop.f32.mrb[64].mxu1  ;;  %v5713_v27 = vpop.f32.mrb[65].mxu0 }
 0x456   : > { %v4137_v29 = vmul.f32 %v6079_v24, %v3846_v26  ;;  %v5719_v30 = vpop.f32.mrb[65].mxu1  ;;  %v3803_v32 = vpop.f32.mrb[66].mxu0 }
 0x457   : > { %v4144_v33 = vpack.c.bf16 %v4136_v25, %v4136_v25  ;;  %v3849_v18 = vpop.f32.mrb[66].mxu1  ;;  %v5714_v34 = vpop.f32.mrb[67].mxu0 }
 0x458   : > { %v4145_v36 = vpack.c.bf16 %v4137_v29, %v4137_v29  ;;  %v5720_v5 = vpop.f32.mrb[67].mxu1  ;;  %v6085_v55 = vpop.eup %6084 }
 0x459   : > { %5760 = vmatmul.mubr.msk.bf16.vlgmr.msra.gmra.mrb[80].mxu0 %vm3310_vm2, %v4144_v33 }
 0x45a   : > { %5766 = vmatmul.mubr.msk.bf16.vlgmr.msra.gmra.mrb[80].mxu1 %vm3310_vm2, %v4145_v36  ;;  %5770 = vmatpush3.bf16.msra.mxu0 %v4257_v35 }
 0x45b   : > { %5771 = vmatprep.mubr.msk.bf16.mxu0 %vm6174_vm0, %v6173_v1  ;;  %5776 = vmatpush3.bf16.msra.mxu1 %v4303_v37 }
 0x45c   : > { %5777 = vmatprep.mubr.msk.bf16.mxu1 %vm6174_vm0, %v6173_v1  ;;  %5781 = vmatprep.subr.bf16.mxu0 %v6173_v1  ;;  %v6087_v8 = vpop.eup %6086 }
 0x45d   : > { %5787 = vmatprep.subr.bf16.mxu1 %v6173_v1 }
 0x46d   : > { %v3747_v16 = vpop.xlane.xlu1 %3746 }
 0x46e   : > { %6088 = vrcp.f32 %v3747_v16 }
 0x471   : > { %v3750_v17 = vpop.xlane.xlu0 %3749 }
 0x472   : > { %6090 = vrcp.f32 %v3750_v17 }
 0x474   : > { %v3892_v41 = vpop.f32.mrb[68].mxu0 }
 0x475   : > { %v4138_v44 = vmul.f32 %v6081_v40, %v3892_v41  ;;  %v5725_v43 = vpop.f32.mrb[69].mxu0 }
 0x476   : > { %v3895_v45 = vpop.f32.mrb[70].mxu0 }
 0x477   : > { %v4146_v46 = vpack.c.bf16 %v4138_v44, %v4138_v44  ;;  %v5726_v47 = vpop.f32.mrb[71].mxu0 }
 0x478   : > { %v3938_v50 = vpop.f32.mrb[68].mxu1  ;;  %v6089_v19 = vpop.eup %6088 }
 0x479   : > { %v4139_v52 = vmul.f32 %v6083_v49, %v3938_v50  ;;  %v5731_v53 = vpop.f32.mrb[69].mxu1  ;;  %5772 = vmatmul.mubr.msk.bf16.vlgmr.msra.gmra.mrb[84].mxu0 %vm3310_vm2, %v4146_v46 }
 0x47a   : > { %v3941_v54 = vpop.f32.mrb[70].mxu1  ;;  %5782 = vmatpush3.bf16.msra.mxu0 %v4349_v48  ;;  %5783 = vmatprep.mubr.msk.bf16.mxu0 %vm6174_vm0, %v6173_v1 }
 0x47b   : > { %v4147_v56 = vpack.c.bf16 %v4139_v52, %v4139_v52  ;;  %v5732_v57 = vpop.f32.mrb[71].mxu1  ;;  %5793 = vmatprep.subr.bf16.mxu0 %v6173_v1 }
 0x47c   : > { %v6091_v25 = vpop.eup %6090 }
 0x47d   : > { %5778 = vmatmul.mubr.msk.bf16.vlgmr.msra.gmra.mrb[84].mxu1 %vm3310_vm2, %v4147_v56 }
 0x47e   : > { %5788 = vmatpush3.bf16.msra.mxu1 %v4395_v58  ;;  %5789 = vmatprep.mubr.msk.bf16.mxu1 %vm6174_vm0, %v6173_v1 }
 0x47f   : > { %5799 = vmatprep.subr.bf16.mxu1 %v6173_v1 }
 0x494   : > { %v3984_v60 = vpop.f32.mrb[72].mxu0 }
 0x495   : > { %v4140_v63 = vmul.f32 %v6085_v55, %v3984_v60  ;;  %v5737_v0 = vpop.f32.mrb[73].mxu0 }
 0x496   : > { %v3987_v2 = vpop.f32.mrb[74].mxu0 }
 0x497   : > { %v4148_v3 = vpack.c.bf16 %v4140_v63, %v4140_v63  ;;  %v5738_v6 = vpop.f32.mrb[75].mxu0  ;;  %v3290_v63 = vpop.xlane.xlu1 %3289 }
 0x498   : > { %v4030_v9 = vpop.f32.mrb[72].mxu1  ;;  %v4912_v6 = vld [vmem:[%s7539_s13] ss:$0 sm:$0xff]  ;;  %vm3291_vm7 = vcmp.eq.f32.partialorder %v3290_v63, 0.0 }
 0x499   : > { %v4141_v12 = vmul.f32 %v6087_v8, %v4030_v9  ;;  %v5743_v13 = vpop.f32.mrb[73].mxu1  ;;  %5784 = vmatmul.mubr.msk.bf16.vlgmr.msra.gmra.mrb[88].mxu0 %vm3310_vm2, %v4148_v3 }
 0x49a   : > { %v4033_v14 = vpop.f32.mrb[74].mxu1  ;;  %5794 = vmatpush3.bf16.msra.mxu0 %v4441_v7  ;;  %5795 = vmatprep.mubr.msk.bf16.mxu0 %vm6174_vm0, %v6173_v1  ;;  %v4887_v13 = vsel %vm3291_vm7, 1.0, %v6173_v1 }
 0x49b   : > { %v4149_v4 = vpack.c.bf16 %v4141_v12, %v4141_v12  ;;  %v5744_v10 = vpop.f32.mrb[75].mxu1 }
 0x49d   : > { %5790 = vmatmul.mubr.msk.bf16.vlgmr.msra.gmra.mrb[88].mxu1 %vm3310_vm2, %v4149_v4 }
 0x49e   : > { %5800 = vmatpush3.bf16.msra.mxu1 %v4487_v15  ;;  %5801 = vmatprep.mubr.msk.bf16.mxu1 %vm6174_vm0, %v6173_v1 }
 0x4b4   : > { %v4076_v20 = vpop.f32.mrb[76].mxu0 }
 0x4b5   : > { %v4142_v21 = vmul.f32 %v6089_v19, %v4076_v20  ;;  %v5749_v31 = vpop.f32.mrb[77].mxu0 }
 0x4b6   : > { %v4079_v22 = vpop.f32.mrb[78].mxu0 }
 0x4b7   : > { %v4150_v23 = vpack.c.bf16 %v4142_v21, %v4142_v21  ;;  %v5750_v24 = vpop.f32.mrb[79].mxu0 }
 0x4b8   : > { %v4122_v26 = vpop.f32.mrb[76].mxu1 }
 0x4b9   : > { %v4143_v27 = vmul.f32 %v6091_v25, %v4122_v26  ;;  %v5755_v28 = vpop.f32.mrb[77].mxu1  ;;  %5796 = vmatmul.mubr.msk.bf16.vlgmr.msra.gmra.mrb[92].mxu0 %vm3310_vm2, %v4150_v23 }
 0x4ba   : > { %v4125_v29 = vpop.f32.mrb[78].mxu1 }
 0x4bb   : > { %v4151_v30 = vpack.c.bf16 %v4143_v27, %v4143_v27  ;;  %v5756_v32 = vpop.f32.mrb[79].mxu1 }
 0x4bd   : > { %5802 = vmatmul.mubr.msk.bf16.vlgmr.msra.gmra.mrb[92].mxu1 %vm3310_vm2, %v4151_v30 }
 0x52c   : > { %v4201_v33 = vpop.f32.mrb[80].mxu0 }
 0x52d   : > { %v4247_v18 = vpop.f32.mrb[80].mxu1  ;;  %v5761_v34 = vpop.f32.mrb[81].mxu0 }
 0x52e   : > { %v4529_v35 = vadd.f32 %v4247_v18, %v4201_v33  ;;  %v5767_v36 = vpop.f32.mrb[81].mxu1  ;;  %v4204_v5 = vpop.f32.mrb[82].mxu0 }
 0x52f   : > { %v4250_v37 = vpop.f32.mrb[82].mxu1  ;;  %v5762_v38 = vpop.f32.mrb[83].mxu0 }
 0x530   : > { %v5768_v39 = vpop.f32.mrb[83].mxu1 }
 0x54c   : > { %v4293_v40 = vpop.f32.mrb[84].mxu0 }
 0x54d   : > { %v4530_v41 = vadd.f32 %v4529_v35, %v4293_v40  ;;  %v5773_v42 = vpop.f32.mrb[85].mxu0 }
 0x54e   : > { %v4296_v44 = vpop.f32.mrb[86].mxu0 }
 0x54f   : > { %v5774_v43 = vpop.f32.mrb[87].mxu0 }
 0x550   : > { %v4339_v45 = vpop.f32.mrb[84].mxu1 }
 0x551   : > { %v4531_v46 = vadd.f32 %v4530_v41, %v4339_v45  ;;  %v5779_v47 = vpop.f32.mrb[85].mxu1 }
 0x552   : > { %v4342_v48 = vpop.f32.mrb[86].mxu1 }
 0x553   : > { %v5780_v49 = vpop.f32.mrb[87].mxu1 }
 0x56c   : > { %v4385_v50 = vpop.f32.mrb[88].mxu0 }
 0x56d   : > { %v4532_v51 = vadd.f32 %v4531_v46, %v4385_v50  ;;  %v5785_v52 = vpop.f32.mrb[89].mxu0 }
 0x56e   : > { %v4388_v53 = vpop.f32.mrb[90].mxu0 }
 0x56f   : > { %v5786_v54 = vpop.f32.mrb[91].mxu0 }
 0x570   : > { %v4431_v56 = vpop.f32.mrb[88].mxu1 }
 0x571   : > { %v4533_v57 = vadd.f32 %v4532_v51, %v4431_v56  ;;  %v5791_v58 = vpop.f32.mrb[89].mxu1 }
 0x572   : > { %v4434_v59 = vpop.f32.mrb[90].mxu1 }
 0x573   : > { %v5792_v61 = vpop.f32.mrb[91].mxu1 }
 0x58c   : > { %v4477_v55 = vpop.f32.mrb[92].mxu0 }
 0x58d   : > { %v4534_v60 = vadd.f32 %v4533_v57, %v4477_v55  ;;  %v5797_v62 = vpop.f32.mrb[93].mxu0 }
 0x58e   : > { %v4480_v0 = vpop.f32.mrb[94].mxu0 }
 0x58f   : > { %v5798_v2 = vpop.f32.mrb[95].mxu0 }
 0x590   : > { %v4523_v3 = vpop.f32.mrb[92].mxu1 }
 0x591   : > { %v4535_v7 = vadd.f32 %v4534_v60, %v4523_v3  ;;  %v5803_v8 = vpop.f32.mrb[93].mxu1 }
 0x592   : > { %v4526_v9 = vpop.f32.mrb[94].mxu1 }
 0x593   : > { %v4543_v11 = vadd.f32 %v4912_v6, %v4535_v7  ;;  %v5804_v12 = vpop.f32.mrb[95].mxu1 }
 0x595   : > { %v4544_v14 = vmul.f32 %v4887_v13, %v4543_v11 }
 0x597   : > { %4545 = vst [vmem:[%s514_s20] sm:$0xff] %v4544_v14 }
 0x598   : > { %6106 = shalt.err (!%p6103_p5)
}
 0x599   : > { %s6107_s15 = scalar_lea.hbm %s7479_s0, 128  ;;  %s6111_s26 = scalar_lea.hbm %s7540_s14, 256 }
 0x59a   : > { %p6108_p6 = scmp.ne.s32.totalorder %s7479_s0, %s6107_s15  ;;  %p6112_p10 = scmp.lt.u32.totalorder %s7479_s0, %s7540_s14 }
 0x59b   : > { %p6113_p11 = scmp.lt.u32.totalorder %s6111_s26, %s6107_s15  ;;  %p6115_p13 = scmp.lt.u32.totalorder %s6107_s15, %s7479_s0 }
 0x59c   : > { %p6109_p7 = pnand %p6108_p6, %p6293_p4 }
 0x59d   : > { %p6114_p12 = por %p6113_p11, %p6112_p10 }
 0x59e   : > { %p6110_p9 = pneg %p6109_p7 }
 0x59f   : > { %p6116_p0 = por %p6115_p13, %p6114_p12 }
 0x5a1   : > { %p6117_p1 = pnand %p6116_p0, %p6110_p9 }
 0x5a3   : > { %6120 = shalt.err (!%p6117_p1)
}
 0x5a4   : > { %5805 = dma.vmem_to_hbm [thread:$0]  (%p6293_p4), %s7481_s24, 128, %s7479_s0, %s4547_s17  }
 0x5a5 PF: > { %p5811_p2 = scmp.ge.s32.totalorder %s6171_s18, 2  ;;  %s4573_s16 = sand.u32 1, %s6151_s29  }
 0x5a6   : > { %s4574_s28 = scalar_lea.sflag [#allocation5], %s4573_s16 }
 0x5a7   : > { %p5808_p3 = pnand %p5811_p2, %p6300_p8 }
 0x5a9   : > { %6146 = dma.done.wait (!%p5808_p3), %s4574_s28, 128  }
 0x5aa   : > { %6148 = vsyncadd (!%p5808_p3), %s4574_s28, 4294967168  ;;  %s27_s18 = sadd.s32 1, %s6171_s18   ;;  %s7552_s19 = sld [smem:[#allocation7_spill]] }
 0x5ab   : > { %p24_p5 = scmp.ge.s32.totalorder %s27_s18, 4   ;;  %s7553_s15 = sld [smem:[#allocation10_spill]] }
 0x5ac   : > { %s7554_s16 = sld [smem:[#allocation8_spill]]  ;;  %s7555_s17 = sld [smem:[#allocation9_spill]] }
 0x5ad   : > { %s7556_s29 = smov %s6155_s30  ;;  %26 = sbr.rel (!%p24_p5) target bundleno = 6 (0x6), region = 121 }
 0x5b0   : > { %s7557_s30 = smov %s7552_s19 }
 0x5b4   :  { %4579 = vsyncpa [#allocation5], 1 }
 0x5b5   :  { %4581 = vsyncpa [#allocation5 + $0x1], 1 }

</bundles_post_ra>
